<compile_context>
chip_gen: v7x
topology: tpu7x:2x2x1
jax: 0.10.0
libtpu: 0.0.40
codegen_flags: <defaults>
</compile_context>

<pallas_src>
import functools

import jax
import jax.numpy as jnp
from jax import lax
from jax.experimental import pallas as pl
from jax.experimental.pallas import tpu as pltpu

EPS = 1e-6  # matches InstanceNorm2d(eps=1e-06)


def _get_same_padding(kernel: int, dilation: int) -> int:
    return (kernel + (kernel - 1) * (dilation - 1) - 1) // 2


def _elu(x):
    # torch.nn.ELU(alpha=1.0)
    return jnp.where(x > 0, x, jnp.exp(x) - 1.0)


def _in_elu(x, gamma, beta):
    # InstanceNorm (per-channel stats over the lane/spatial axis, biased var,
    # centered form for numerical stability) with the affine transform folded
    # into a single scale/shift full-tile pass, followed by ELU.  All
    # elementwise math stays in f32 (v5e has no bf16 VPU/EUP).
    mean = jnp.mean(x, axis=-1, keepdims=True)
    xc = x - mean
    var = jnp.mean(xc * xc, axis=-1, keepdims=True)
    scale = gamma * lax.rsqrt(var + EPS)            # (C,1) column math (cheap)
    y = xc * scale + beta                           # one fused full-tile pass
    return jnp.where(y > 0, y, jnp.exp(y) - 1.0)    # ELU (exp runs on the EUP)


def _resblock_kernel(x_ref, mask_ref, g1_ref, b1_ref, w1t_ref, g2_ref, b2_ref,
                     w2s_ref, g3_ref, b3_ref, w3t_ref, o_ref,
                     *, kernel, dilation, pad, H, W, samples_per_step):
    HW = H * W

    # Grid-invariant parameters / masks: loaded once per grid step, hoisted
    # out of the per-sample loop (Pallas also only DMAs them once since their
    # block index never changes).
    g1, b1 = g1_ref[...], b1_ref[...]               # (C, 1)
    g2, b2 = g2_ref[...], b2_ref[...]               # (n_b, 1)
    g3, b3 = g3_ref[...], b3_ref[...]               # (n_b, 1)
    w1t = w1t_ref[...]                              # (n_b, C)        bf16
    w2s = w2s_ref[...]                              # (n_b, k*k*n_b)  bf16
    w3t = w3t_ref[...]                              # (C, n_b)        bf16
    mask = mask_ref[...].astype(jnp.float32)        # (k*k, HW)

    for s in range(samples_per_step):
        # --- InstanceNorm(n_c) -> ELU -> Conv2d(n_c, n_b, 1, bias=False) ---
        h = _in_elu(x_ref[s].astype(jnp.float32), g1, b1)       # (C, HW) f32
        h = jnp.dot(w1t, h.astype(jnp.bfloat16),                # (n_b, C)@(C, HW)
                    preferred_element_type=jnp.float32)

        # --- InstanceNorm(n_b) -> ELU -> dilated kxk conv (same padding) ---
        h = _in_elu(h, g2, b2)
        # The kxk dilated conv is ONE MXU matmul of contraction depth k*k*n_b:
        # each tap is a cyclic lane roll (XLU — otherwise idle slot) of the
        # activation with a precomputed border mask zeroing the wrapped halo;
        # taps are stacked along the sublane axis and contracted against the
        # host-flattened (n_b, k*k*n_b) weight tile.
        # TODO(synk): when n_b % 16 == 0, roll/mask/stack in bf16 to halve XLU
        #             and VALU traffic; the f32 stack keeps the sublane concat
        #             tile-aligned (8-row f32 tiles) for any n_b.
        taps = []
        t = 0
        for ki in range(kernel):
            for kj in range(kernel):
                off = (ki * dilation - pad) * W + (kj * dilation - pad)
                if off == 0:
                    taps.append(h)
                else:
                    tap = pltpu.roll(h, shift=(-off) % HW, axis=1)
                    taps.append(tap * mask[t:t + 1, :])
                t += 1
        stacked = jnp.concatenate(taps, axis=0).astype(jnp.bfloat16)  # (k*k*n_b, HW)
        h = jnp.dot(w2s, stacked, preferred_element_type=jnp.float32)  # (n_b, HW)

        # --- InstanceNorm(n_b) -> ELU -> Dropout -> Conv2d(n_b, n_c, 1) ----
        # TODO(synk): Dropout(p=0.15) is identity in eval mode; the
        #             training-mode stochastic mask is not reproduced here.
        h = _in_elu(h, g3, b3)
        h = jnp.dot(w3t, h.astype(jnp.bfloat16),                 # (C, n_b)@(n_b, HW)
                    preferred_element_type=jnp.float32)

        # Residual read deferred to the store so no extra f32 copy of x stays
        # live across the three matmuls; explicit cast so bf16 I/O also works.
        o_ref[s] = (x_ref[s].astype(jnp.float32) + h).astype(o_ref.dtype)


def resblock2d_bottleneck(x_nchw, params, *, kernel=3, dilation=1):
    pad = _get_same_padding(kernel, dilation)
    B, C, H, W = x_nchw.shape
    HW = H * W
    n_b = params["w1"].shape[1]

    # The off==0 tap-skip and wrap masking assume the receptive field is
    # narrower than the image.
    assert W > (kernel - 1) * dilation and H > (kernel - 1) * dilation

    # NCHW with spatial flattened == channels-on-sublane / spatial-on-lane.
    x = x_nchw.reshape(B, C, HW)

    # Host-side parameter re-layouts (once): matmul LHS weights in bf16 (MXU
    # native rate; f32 accumulation in-kernel), affine params as (C, 1)
    # columns broadcasting along lanes, and w2 flattened to a single
    # lane-dense (n_b, k*k*n_b) tile matching the stacked-tap operand order.
    g1 = params["g1"].reshape(C, 1).astype(jnp.float32)
    b1 = params["b1"].reshape(C, 1).astype(jnp.float32)
    g2 = params["g2"].reshape(n_b, 1).astype(jnp.float32)
    b2 = params["b2"].reshape(n_b, 1).astype(jnp.float32)
    g3 = params["g3"].reshape(n_b, 1).astype(jnp.float32)
    b3 = params["b3"].reshape(n_b, 1).astype(jnp.float32)
    w1t = jnp.transpose(params["w1"]).astype(jnp.bfloat16)                 # (n_b, C)
    w2s = (jnp.transpose(params["w2"], (3, 0, 1, 2))                       # (out,ki,kj,in)
           .reshape(n_b, kernel * kernel * n_b).astype(jnp.bfloat16))      # (n_b, k*k*n_b)
    w3t = jnp.transpose(params["w3"]).astype(jnp.bfloat16)                 # (C, n_b)

    # Border-validity masks for the k*k conv taps (grid-invariant; bf16 to
    # halve their VMEM/DMA footprint — values are exactly 0/1).
    ii = jnp.arange(H, dtype=jnp.int32).reshape(H, 1)
    jj = jnp.arange(W, dtype=jnp.int32).reshape(1, W)
    rows = []
    for ki in range(kernel):
        for kj in range(kernel):
            oi = ki * dilation - pad
            oj = kj * dilation - pad
            valid = ((ii + oi >= 0) & (ii + oi < H) &
                     (jj + oj >= 0) & (jj + oj < W))
            rows.append(valid.reshape(HW))
    tap_mask = jnp.stack(rows, axis=0).astype(jnp.bfloat16)                # (k*k, HW)

    # Small per-sample tiles are pure grid-step overhead (~0.35us/step):
    # process several batch elements per grid step when they fit comfortably.
    itemsize = x.dtype.itemsize
    per_sample_bytes = C * HW * (2 * itemsize + 8)
    bt = 1
    for cand in range(1, B + 1):
        if B % cand == 0 and cand * per_sample_bytes <= (2 << 20):
            bt = cand

    kern = functools.partial(_resblock_kernel, kernel=kernel, dilation=dilation,
                             pad=pad, H=H, W=W, samples_per_step=bt)

    # VMEM budget derived from the actual block sizes (not a hard-coded cap):
    # double-buffered in/out blocks + grid-invariant params + in-kernel
    # intermediates, clamped to [32 MiB, 100 MiB].
    def _nbytes(a):
        return a.size * a.dtype.itemsize
    io_bytes = 2 * 2 * bt * C * HW * itemsize
    param_bytes = 2 * sum(_nbytes(a) for a in
                          (tap_mask, g1, b1, w1t, g2, b2, w2s, g3, b3, w3t))
    work_bytes = (C * HW * 4
                  + (kernel * kernel + 4) * n_b * HW * 4
                  + kernel * kernel * n_b * HW * 2)
    vmem_limit = int(min(max(io_bytes + param_bytes + work_bytes + (16 << 20),
                             32 << 20), 100 << 20))

    # TODO(synk): for very large C*H*W (v7x: 64 MiB VMEM) add an H-strip grid
    #             axis with `pad` halo rows and two-pass InstanceNorm stats.
    out = pl.pallas_call(
        kern,
        out_shape=jax.ShapeDtypeStruct((B, C, HW), x.dtype),
        grid_spec=pltpu.PrefetchScalarGridSpec(
            num_scalar_prefetch=0,
            grid=(B // bt,),
            in_specs=[
                pl.BlockSpec((bt, C, HW), lambda b: (b, 0, 0)),           # x
                pl.BlockSpec((kernel * kernel, HW), lambda b: (0, 0)),    # tap masks
                pl.BlockSpec((C, 1), lambda b: (0, 0)),                   # gamma1
                pl.BlockSpec((C, 1), lambda b: (0, 0)),                   # beta1
                pl.BlockSpec((n_b, C), lambda b: (0, 0)),                 # w1^T
                pl.BlockSpec((n_b, 1), lambda b: (0, 0)),                 # gamma2
                pl.BlockSpec((n_b, 1), lambda b: (0, 0)),                 # beta2
                pl.BlockSpec((n_b, kernel * kernel * n_b),
                             lambda b: (0, 0)),                           # w2 stacked
                pl.BlockSpec((n_b, 1), lambda b: (0, 0)),                 # gamma3
                pl.BlockSpec((n_b, 1), lambda b: (0, 0)),                 # beta3
                pl.BlockSpec((C, n_b), lambda b: (0, 0)),                 # w3^T
            ],
            out_specs=pl.BlockSpec((bt, C, HW), lambda b: (b, 0, 0)),
        ),
        compiler_params=pltpu.CompilerParams(
            dimension_semantics=("parallel",),   # batch blocks independent
            vmem_limit_bytes=vmem_limit,
        ),
    )(x, tap_mask, g1, b1, w1t, g2, b2, w2s, g3, b3, w3t)
    return out.reshape(B, C, H, W)


def resblock_ref(x_nchw, params, *, kernel=3, dilation=1):
    """Pure-JAX (lax.conv, float32) reference in NCHW for validation."""
    pad = _get_same_padding(kernel, dilation)

    def inorm(x, g, b):
        mean = jnp.mean(x, axis=(2, 3), keepdims=True)
        var = jnp.mean((x - mean) ** 2, axis=(2, 3), keepdims=True)
        return ((x - mean) / jnp.sqrt(var + EPS)
                * g[None, :, None, None] + b[None, :, None, None])

    h = _elu(inorm(x_nchw, params["g1"].ravel(), params["b1"].ravel()))
    w1 = jnp.transpose(params["w1"])[:, :, None, None]          # (n_b, C, 1, 1)
    h = lax.conv_general_dilated(h, w1, (1, 1), "VALID")
    h = _elu(inorm(h, params["g2"].ravel(), params["b2"].ravel()))
    w2 = jnp.transpose(params["w2"], (3, 2, 0, 1))               # (n_b, n_b, k, k)
    h = lax.conv_general_dilated(h, w2, (1, 1), [(pad, pad), (pad, pad)],
                                 rhs_dilation=(dilation, dilation))
    h = _elu(inorm(h, params["g3"].ravel(), params["b3"].ravel()))
    w3 = jnp.transpose(params["w3"])[:, :, None, None]          # (C, n_b, 1, 1)
    h = lax.conv_general_dilated(h, w3, (1, 1), "VALID")
    return x_nchw + h


if __name__ == "__main__":
    key = jax.random.PRNGKey(0)
    B, C, Hs, Ws = 2, 16, 16, 16
    n_b = C // 2
    kernel, dilation = 3, 1

    keys = jax.random.split(key, 10)
    params = {
        "g1": 1.0 + 0.1 * jax.random.normal(keys[0], (1, C), jnp.float32),
        "b1": 0.1 * jax.random.normal(keys[1], (1, C), jnp.float32),
        "w1": 0.2 * jax.random.normal(keys[2], (C, n_b), jnp.float32),
        "g2": 1.0 + 0.1 * jax.random.normal(keys[3], (1, n_b), jnp.float32),
        "b2": 0.1 * jax.random.normal(keys[4], (1, n_b), jnp.float32),
        "w2": 0.2 * jax.random.normal(keys[5], (kernel, kernel, n_b, n_b),
                                      jnp.float32),
        "g3": 1.0 + 0.1 * jax.random.normal(keys[6], (1, n_b), jnp.float32),
        "b3": 0.1 * jax.random.normal(keys[7], (1, n_b), jnp.float32),
        "w3": 0.2 * jax.random.normal(keys[8], (n_b, C), jnp.float32),
    }
    x = jax.random.normal(keys[9], (B, C, Hs, Ws), jnp.float32)

    out = resblock2d_bottleneck(x, params, kernel=kernel, dilation=dilation)
    out = jax.block_until_ready(out)

    ref = resblock_ref(x, params, kernel=kernel, dilation=dilation)
    err = float(jnp.max(jnp.abs(out - ref)))
    assert out.shape == x.shape and out.dtype == x.dtype
    # Tolerance accounts for bf16 MXU operands (f32 accumulation) vs f32 ref.
    if err > 1e-1:
        raise AssertionError(f"Pallas vs reference mismatch: max abs err {err}")
    print("KERNEL_OK")
</pallas_src>

<mosaic_0001>
module attributes {stable_mosaic.version = 11 : i64} {
  func.func @_resblock_kernel(%arg0: i32, %arg1: memref<2x16x256xf32, #tpu.memory_space<vmem>>, %arg2: memref<9x256xbf16, #tpu.memory_space<vmem>>, %arg3: memref<16x1xf32, #tpu.memory_space<vmem>>, %arg4: memref<16x1xf32, #tpu.memory_space<vmem>>, %arg5: memref<8x16xbf16, #tpu.memory_space<vmem>>, %arg6: memref<8x1xf32, #tpu.memory_space<vmem>>, %arg7: memref<8x1xf32, #tpu.memory_space<vmem>>, %arg8: memref<8x72xbf16, #tpu.memory_space<vmem>>, %arg9: memref<8x1xf32, #tpu.memory_space<vmem>>, %arg10: memref<8x1xf32, #tpu.memory_space<vmem>>, %arg11: memref<16x8xbf16, #tpu.memory_space<vmem>>, %arg12: memref<2x16x256xf32, #tpu.memory_space<vmem>>) attributes {dimension_semantics = [#tpu.dimension_semantics<parallel>], iteration_bounds = array<i64: 1>, scalar_prefetch = 0 : i64, scratch_operands = 0 : i64, tpu.core_type = #tpu.core_type<tc>, window_params = [{transform_indices = @transform_0, window_bounds = array<i64: 2, 16, 256>}, {pipeline_mode = #tpu.pipeline_mode<synchronous>, transform_indices = @transform_1, window_bounds = array<i64: 9, 256>}, {pipeline_mode = #tpu.pipeline_mode<synchronous>, transform_indices = @transform_2, window_bounds = array<i64: 16, 1>}, {pipeline_mode = #tpu.pipeline_mode<synchronous>, transform_indices = @transform_3, window_bounds = array<i64: 16, 1>}, {pipeline_mode = #tpu.pipeline_mode<synchronous>, transform_indices = @transform_4, window_bounds = array<i64: 8, 16>}, {pipeline_mode = #tpu.pipeline_mode<synchronous>, transform_indices = @transform_5, window_bounds = array<i64: 8, 1>}, {pipeline_mode = #tpu.pipeline_mode<synchronous>, transform_indices = @transform_6, window_bounds = array<i64: 8, 1>}, {pipeline_mode = #tpu.pipeline_mode<synchronous>, transform_indices = @transform_7, window_bounds = array<i64: 8, 72>}, {pipeline_mode = #tpu.pipeline_mode<synchronous>, transform_indices = @transform_8, window_bounds = array<i64: 8, 1>}, {pipeline_mode = #tpu.pipeline_mode<synchronous>, transform_indices = @transform_9, window_bounds = array<i64: 8, 1>}, {pipeline_mode = #tpu.pipeline_mode<synchronous>, transform_indices = @transform_10, window_bounds = array<i64: 16, 8>}, {transform_indices = @transform_11, window_bounds = array<i64: 2, 16, 256>}]} {
    %c0 = arith.constant 0 : index
    %c0_0 = arith.constant 0 : index
    %0 = vector.load %arg3[%c0, %c0_0] : memref<16x1xf32, #tpu.memory_space<vmem>>, vector<16x1xf32>
    %c0_1 = arith.constant 0 : index
    %c0_2 = arith.constant 0 : index
    %1 = vector.load %arg4[%c0_1, %c0_2] : memref<16x1xf32, #tpu.memory_space<vmem>>, vector<16x1xf32>
    %c0_3 = arith.constant 0 : index
    %c0_4 = arith.constant 0 : index
    %2 = vector.load %arg6[%c0_3, %c0_4] : memref<8x1xf32, #tpu.memory_space<vmem>>, vector<8x1xf32>
    %c0_5 = arith.constant 0 : index
    %c0_6 = arith.constant 0 : index
    %3 = vector.load %arg7[%c0_5, %c0_6] : memref<8x1xf32, #tpu.memory_space<vmem>>, vector<8x1xf32>
    %c0_7 = arith.constant 0 : index
    %c0_8 = arith.constant 0 : index
    %4 = vector.load %arg9[%c0_7, %c0_8] : memref<8x1xf32, #tpu.memory_space<vmem>>, vector<8x1xf32>
    %c0_9 = arith.constant 0 : index
    %c0_10 = arith.constant 0 : index
    %5 = vector.load %arg10[%c0_9, %c0_10] : memref<8x1xf32, #tpu.memory_space<vmem>>, vector<8x1xf32>
    %c0_11 = arith.constant 0 : index
    %c0_12 = arith.constant 0 : index
    %6 = vector.load %arg5[%c0_11, %c0_12] : memref<8x16xbf16, #tpu.memory_space<vmem>>, vector<8x16xbf16>
    %c0_13 = arith.constant 0 : index
    %c0_14 = arith.constant 0 : index
    %7 = vector.load %arg8[%c0_13, %c0_14] : memref<8x72xbf16, #tpu.memory_space<vmem>>, vector<8x72xbf16>
    %c0_15 = arith.constant 0 : index
    %c0_16 = arith.constant 0 : index
    %8 = vector.load %arg11[%c0_15, %c0_16] : memref<16x8xbf16, #tpu.memory_space<vmem>>, vector<16x8xbf16>
    %c0_17 = arith.constant 0 : index
    %c0_18 = arith.constant 0 : index
    %9 = vector.load %arg2[%c0_17, %c0_18] : memref<9x256xbf16, #tpu.memory_space<vmem>>, vector<9x256xbf16>
    %10 = arith.extf %9 : vector<9x256xbf16> to vector<9x256xf32>
    %c0_19 = arith.constant 0 : index
    %c0_20 = arith.constant 0 : index
    %c0_21 = arith.constant 0 : index
    %11 = vector.load %arg1[%c0_19, %c0_20, %c0_21] : memref<2x16x256xf32, #tpu.memory_space<vmem>>, vector<1x16x256xf32>
    %12 = vector.shape_cast %11 : vector<1x16x256xf32> to vector<16x256xf32>
    %cst = arith.constant dense<0.000000e+00> : vector<16xf32>
    %13 = vector.multi_reduction <add>, %12, %cst [1] : vector<16x256xf32> to vector<16xf32>
    %14 = vector.shape_cast %13 : vector<16xf32> to vector<16x1xf32>
    %cst_22 = arith.constant 2.560000e+02 : f32
    %15 = vector.broadcast %cst_22 : f32 to vector<16x1xf32>
    %16 = arith.divf %14, %15 : vector<16x1xf32>
    %17 = vector.broadcast %16 : vector<16x1xf32> to vector<16x256xf32>
    %18 = arith.subf %12, %17 : vector<16x256xf32>
    %19 = arith.mulf %18, %18 : vector<16x256xf32>
    %cst_23 = arith.constant dense<0.000000e+00> : vector<16xf32>
    %20 = vector.multi_reduction <add>, %19, %cst_23 [1] : vector<16x256xf32> to vector<16xf32>
    %21 = vector.shape_cast %20 : vector<16xf32> to vector<16x1xf32>
    %cst_24 = arith.constant 2.560000e+02 : f32
    %22 = vector.broadcast %cst_24 : f32 to vector<16x1xf32>
    %23 = arith.divf %21, %22 : vector<16x1xf32>
    %cst_25 = arith.constant 9.99999997E-7 : f32
    %24 = vector.broadcast %cst_25 : f32 to vector<16x1xf32>
    %25 = arith.addf %23, %24 : vector<16x1xf32>
    %26 = math.rsqrt %25 : vector<16x1xf32>
    %27 = arith.mulf %0, %26 : vector<16x1xf32>
    %28 = vector.broadcast %27 : vector<16x1xf32> to vector<16x256xf32>
    %29 = arith.mulf %18, %28 : vector<16x256xf32>
    %30 = vector.broadcast %1 : vector<16x1xf32> to vector<16x256xf32>
    %31 = arith.addf %29, %30 : vector<16x256xf32>
    %cst_26 = arith.constant 0.000000e+00 : f32
    %32 = vector.broadcast %cst_26 : f32 to vector<16x256xf32>
    %33 = arith.cmpf ogt, %31, %32 : vector<16x256xf32>
    %34 = math.exp %31 : vector<16x256xf32>
    %cst_27 = arith.constant 1.000000e+00 : f32
    %35 = vector.broadcast %cst_27 : f32 to vector<16x256xf32>
    %36 = arith.subf %34, %35 : vector<16x256xf32>
    %37 = arith.select %33, %31, %36 : vector<16x256xi1>, vector<16x256xf32>
    %38 = arith.truncf %37 : vector<16x256xf32> to vector<16x256xbf16>
    %cst_28 = arith.constant dense<0.000000e+00> : vector<8x256xf32>
    %39 = tpu.matmul %6, %38, %cst_28 {dimension_numbers = #tpu.dot_dimension_numbers<[1], [0], [0], [1], [0, 0, 1, 1], [], []>} : vector<8x16xbf16>, vector<16x256xbf16>, vector<8x256xf32> -> vector<8x256xf32>
    %cst_29 = arith.constant dense<0.000000e+00> : vector<8xf32>
    %40 = vector.multi_reduction <add>, %39, %cst_29 [1] : vector<8x256xf32> to vector<8xf32>
    %41 = vector.shape_cast %40 : vector<8xf32> to vector<8x1xf32>
    %cst_30 = arith.constant 2.560000e+02 : f32
    %42 = vector.broadcast %cst_30 : f32 to vector<8x1xf32>
    %43 = arith.divf %41, %42 : vector<8x1xf32>
    %44 = vector.broadcast %43 : vector<8x1xf32> to vector<8x256xf32>
    %45 = arith.subf %39, %44 : vector<8x256xf32>
    %46 = arith.mulf %45, %45 : vector<8x256xf32>
    %cst_31 = arith.constant dense<0.000000e+00> : vector<8xf32>
    %47 = vector.multi_reduction <add>, %46, %cst_31 [1] : vector<8x256xf32> to vector<8xf32>
    %48 = vector.shape_cast %47 : vector<8xf32> to vector<8x1xf32>
    %cst_32 = arith.constant 2.560000e+02 : f32
    %49 = vector.broadcast %cst_32 : f32 to vector<8x1xf32>
    %50 = arith.divf %48, %49 : vector<8x1xf32>
    %cst_33 = arith.constant 9.99999997E-7 : f32
    %51 = vector.broadcast %cst_33 : f32 to vector<8x1xf32>
    %52 = arith.addf %50, %51 : vector<8x1xf32>
    %53 = math.rsqrt %52 : vector<8x1xf32>
    %54 = arith.mulf %2, %53 : vector<8x1xf32>
    %55 = vector.broadcast %54 : vector<8x1xf32> to vector<8x256xf32>
    %56 = arith.mulf %45, %55 : vector<8x256xf32>
    %57 = vector.broadcast %3 : vector<8x1xf32> to vector<8x256xf32>
    %58 = arith.addf %56, %57 : vector<8x256xf32>
    %cst_34 = arith.constant 0.000000e+00 : f32
    %59 = vector.broadcast %cst_34 : f32 to vector<8x256xf32>
    %60 = arith.cmpf ogt, %58, %59 : vector<8x256xf32>
    %61 = math.exp %58 : vector<8x256xf32>
    %cst_35 = arith.constant 1.000000e+00 : f32
    %62 = vector.broadcast %cst_35 : f32 to vector<8x256xf32>
    %63 = arith.subf %61, %62 : vector<8x256xf32>
    %64 = arith.select %60, %58, %63 : vector<8x256xi1>, vector<8x256xf32>
    %c17_i32 = arith.constant 17 : i32
    %65 = tpu.dynamic_rotate %64 by %c17_i32 dim 1 : vector<8x256xf32>, i32 -> vector<8x256xf32>
    %66 = vector.extract_strided_slice %10 {offsets = [0, 0], sizes = [1, 256], strides = [1, 1]} : vector<9x256xf32> to vector<1x256xf32>
    %67 = vector.broadcast %66 : vector<1x256xf32> to vector<8x256xf32>
    %68 = arith.mulf %65, %67 : vector<8x256xf32>
    %c16_i32 = arith.constant 16 : i32
    %69 = tpu.dynamic_rotate %64 by %c16_i32 dim 1 : vector<8x256xf32>, i32 -> vector<8x256xf32>
    %70 = vector.extract_strided_slice %10 {offsets = [1, 0], sizes = [1, 256], strides = [1, 1]} : vector<9x256xf32> to vector<1x256xf32>
    %71 = vector.broadcast %70 : vector<1x256xf32> to vector<8x256xf32>
    %72 = arith.mulf %69, %71 : vector<8x256xf32>
    %c15_i32 = arith.constant 15 : i32
    %73 = tpu.dynamic_rotate %64 by %c15_i32 dim 1 : vector<8x256xf32>, i32 -> vector<8x256xf32>
    %74 = vector.extract_strided_slice %10 {offsets = [2, 0], sizes = [1, 256], strides = [1, 1]} : vector<9x256xf32> to vector<1x256xf32>
    %75 = vector.broadcast %74 : vector<1x256xf32> to vector<8x256xf32>
    %76 = arith.mulf %73, %75 : vector<8x256xf32>
    %c1_i32 = arith.constant 1 : i32
    %77 = tpu.dynamic_rotate %64 by %c1_i32 dim 1 : vector<8x256xf32>, i32 -> vector<8x256xf32>
    %78 = vector.extract_strided_slice %10 {offsets = [3, 0], sizes = [1, 256], strides = [1, 1]} : vector<9x256xf32> to vector<1x256xf32>
    %79 = vector.broadcast %78 : vector<1x256xf32> to vector<8x256xf32>
    %80 = arith.mulf %77, %79 : vector<8x256xf32>
    %c255_i32 = arith.constant 255 : i32
    %81 = tpu.dynamic_rotate %64 by %c255_i32 dim 1 : vector<8x256xf32>, i32 -> vector<8x256xf32>
    %82 = vector.extract_strided_slice %10 {offsets = [5, 0], sizes = [1, 256], strides = [1, 1]} : vector<9x256xf32> to vector<1x256xf32>
    %83 = vector.broadcast %82 : vector<1x256xf32> to vector<8x256xf32>
    %84 = arith.mulf %81, %83 : vector<8x256xf32>
    %c241_i32 = arith.constant 241 : i32
    %85 = tpu.dynamic_rotate %64 by %c241_i32 dim 1 : vector<8x256xf32>, i32 -> vector<8x256xf32>
    %86 = vector.extract_strided_slice %10 {offsets = [6, 0], sizes = [1, 256], strides = [1, 1]} : vector<9x256xf32> to vector<1x256xf32>
    %87 = vector.broadcast %86 : vector<1x256xf32> to vector<8x256xf32>
    %88 = arith.mulf %85, %87 : vector<8x256xf32>
    %c240_i32 = arith.constant 240 : i32
    %89 = tpu.dynamic_rotate %64 by %c240_i32 dim 1 : vector<8x256xf32>, i32 -> vector<8x256xf32>
    %90 = vector.extract_strided_slice %10 {offsets = [7, 0], sizes = [1, 256], strides = [1, 1]} : vector<9x256xf32> to vector<1x256xf32>
    %91 = vector.broadcast %90 : vector<1x256xf32> to vector<8x256xf32>
    %92 = arith.mulf %89, %91 : vector<8x256xf32>
    %c239_i32 = arith.constant 239 : i32
    %93 = tpu.dynamic_rotate %64 by %c239_i32 dim 1 : vector<8x256xf32>, i32 -> vector<8x256xf32>
    %94 = vector.extract_strided_slice %10 {offsets = [8, 0], sizes = [1, 256], strides = [1, 1]} : vector<9x256xf32> to vector<1x256xf32>
    %95 = vector.broadcast %94 : vector<1x256xf32> to vector<8x256xf32>
    %96 = arith.mulf %93, %95 : vector<8x256xf32>
    %97 = tpu.concatenate %68, %72, %76, %80, %64, %84, %88, %92, %96 in 0 : vector<8x256xf32>, vector<8x256xf32>, vector<8x256xf32>, vector<8x256xf32>, vector<8x256xf32>, vector<8x256xf32>, vector<8x256xf32>, vector<8x256xf32>, vector<8x256xf32> -> vector<72x256xf32>
    %98 = arith.truncf %97 : vector<72x256xf32> to vector<72x256xbf16>
    %cst_36 = arith.constant dense<0.000000e+00> : vector<8x256xf32>
    %99 = tpu.matmul %7, %98, %cst_36 {dimension_numbers = #tpu.dot_dimension_numbers<[1], [0], [0], [1], [0, 0, 1, 1], [], []>} : vector<8x72xbf16>, vector<72x256xbf16>, vector<8x256xf32> -> vector<8x256xf32>
    %cst_37 = arith.constant dense<0.000000e+00> : vector<8xf32>
    %100 = vector.multi_reduction <add>, %99, %cst_37 [1] : vector<8x256xf32> to vector<8xf32>
    %101 = vector.shape_cast %100 : vector<8xf32> to vector<8x1xf32>
    %cst_38 = arith.constant 2.560000e+02 : f32
    %102 = vector.broadcast %cst_38 : f32 to vector<8x1xf32>
    %103 = arith.divf %101, %102 : vector<8x1xf32>
    %104 = vector.broadcast %103 : vector<8x1xf32> to vector<8x256xf32>
    %105 = arith.subf %99, %104 : vector<8x256xf32>
    %106 = arith.mulf %105, %105 : vector<8x256xf32>
    %cst_39 = arith.constant dense<0.000000e+00> : vector<8xf32>
    %107 = vector.multi_reduction <add>, %106, %cst_39 [1] : vector<8x256xf32> to vector<8xf32>
    %108 = vector.shape_cast %107 : vector<8xf32> to vector<8x1xf32>
    %cst_40 = arith.constant 2.560000e+02 : f32
    %109 = vector.broadcast %cst_40 : f32 to vector<8x1xf32>
    %110 = arith.divf %108, %109 : vector<8x1xf32>
    %cst_41 = arith.constant 9.99999997E-7 : f32
    %111 = vector.broadcast %cst_41 : f32 to vector<8x1xf32>
    %112 = arith.addf %110, %111 : vector<8x1xf32>
    %113 = math.rsqrt %112 : vector<8x1xf32>
    %114 = arith.mulf %4, %113 : vector<8x1xf32>
    %115 = vector.broadcast %114 : vector<8x1xf32> to vector<8x256xf32>
    %116 = arith.mulf %105, %115 : vector<8x256xf32>
    %117 = vector.broadcast %5 : vector<8x1xf32> to vector<8x256xf32>
    %118 = arith.addf %116, %117 : vector<8x256xf32>
    %cst_42 = arith.constant 0.000000e+00 : f32
    %119 = vector.broadcast %cst_42 : f32 to vector<8x256xf32>
    %120 = arith.cmpf ogt, %118, %119 : vector<8x256xf32>
    %121 = math.exp %118 : vector<8x256xf32>
    %cst_43 = arith.constant 1.000000e+00 : f32
    %122 = vector.broadcast %cst_43 : f32 to vector<8x256xf32>
    %123 = arith.subf %121, %122 : vector<8x256xf32>
    %124 = arith.select %120, %118, %123 : vector<8x256xi1>, vector<8x256xf32>
    %125 = arith.truncf %124 : vector<8x256xf32> to vector<8x256xbf16>
    %cst_44 = arith.constant dense<0.000000e+00> : vector<16x256xf32>
    %126 = tpu.matmul %8, %125, %cst_44 {dimension_numbers = #tpu.dot_dimension_numbers<[1], [0], [0], [1], [0, 0, 1, 1], [], []>} : vector<16x8xbf16>, vector<8x256xbf16>, vector<16x256xf32> -> vector<16x256xf32>
    %c0_45 = arith.constant 0 : index
    %c0_46 = arith.constant 0 : index
    %c0_47 = arith.constant 0 : index
    %127 = vector.load %arg1[%c0_45, %c0_46, %c0_47] : memref<2x16x256xf32, #tpu.memory_space<vmem>>, vector<1x16x256xf32>
    %128 = vector.shape_cast %127 : vector<1x16x256xf32> to vector<16x256xf32>
    %129 = arith.addf %128, %126 : vector<16x256xf32>
    %c0_48 = arith.constant 0 : index
    %c0_49 = arith.constant 0 : index
    %c0_50 = arith.constant 0 : index
    %130 = vector.load %arg12[%c0_48, %c0_49, %c0_50] : memref<2x16x256xf32, #tpu.memory_space<vmem>>, vector<1x16x256xf32>
    %131 = vector.shape_cast %130 : vector<1x16x256xf32> to vector<16x256xf32>
    %132 = vector.shape_cast %129 : vector<16x256xf32> to vector<1x16x256xf32>
    tpu.vector_store %arg12[%c0_48, %c0_49, %c0_50], %132 {strides = array<i32>} : memref<2x16x256xf32, #tpu.memory_space<vmem>>, vector<1x16x256xf32>,
    %c1 = arith.constant 1 : index
    %c0_51 = arith.constant 0 : index
    %c0_52 = arith.constant 0 : index
    %133 = vector.load %arg1[%c1, %c0_51, %c0_52] : memref<2x16x256xf32, #tpu.memory_space<vmem>>, vector<1x16x256xf32>
    %134 = vector.shape_cast %133 : vector<1x16x256xf32> to vector<16x256xf32>
    %cst_53 = arith.constant dense<0.000000e+00> : vector<16xf32>
    %135 = vector.multi_reduction <add>, %134, %cst_53 [1] : vector<16x256xf32> to vector<16xf32>
    %136 = vector.shape_cast %135 : vector<16xf32> to vector<16x1xf32>
    %cst_54 = arith.constant 2.560000e+02 : f32
    %137 = vector.broadcast %cst_54 : f32 to vector<16x1xf32>
    %138 = arith.divf %136, %137 : vector<16x1xf32>
    %139 = vector.broadcast %138 : vector<16x1xf32> to vector<16x256xf32>
    %140 = arith.subf %134, %139 : vector<16x256xf32>
    %141 = arith.mulf %140, %140 : vector<16x256xf32>
    %cst_55 = arith.constant dense<0.000000e+00> : vector<16xf32>
    %142 = vector.multi_reduction <add>, %141, %cst_55 [1] : vector<16x256xf32> to vector<16xf32>
    %143 = vector.shape_cast %142 : vector<16xf32> to vector<16x1xf32>
    %cst_56 = arith.constant 2.560000e+02 : f32
    %144 = vector.broadcast %cst_56 : f32 to vector<16x1xf32>
    %145 = arith.divf %143, %144 : vector<16x1xf32>
    %cst_57 = arith.constant 9.99999997E-7 : f32
    %146 = vector.broadcast %cst_57 : f32 to vector<16x1xf32>
    %147 = arith.addf %145, %146 : vector<16x1xf32>
    %148 = math.rsqrt %147 : vector<16x1xf32>
    %149 = arith.mulf %0, %148 : vector<16x1xf32>
    %150 = vector.broadcast %149 : vector<16x1xf32> to vector<16x256xf32>
    %151 = arith.mulf %140, %150 : vector<16x256xf32>
    %152 = vector.broadcast %1 : vector<16x1xf32> to vector<16x256xf32>
    %153 = arith.addf %151, %152 : vector<16x256xf32>
    %cst_58 = arith.constant 0.000000e+00 : f32
    %154 = vector.broadcast %cst_58 : f32 to vector<16x256xf32>
    %155 = arith.cmpf ogt, %153, %154 : vector<16x256xf32>
    %156 = math.exp %153 : vector<16x256xf32>
    %cst_59 = arith.constant 1.000000e+00 : f32
    %157 = vector.broadcast %cst_59 : f32 to vector<16x256xf32>
    %158 = arith.subf %156, %157 : vector<16x256xf32>
    %159 = arith.select %155, %153, %158 : vector<16x256xi1>, vector<16x256xf32>
    %160 = arith.truncf %159 : vector<16x256xf32> to vector<16x256xbf16>
    %cst_60 = arith.constant dense<0.000000e+00> : vector<8x256xf32>
    %161 = tpu.matmul %6, %160, %cst_60 {dimension_numbers = #tpu.dot_dimension_numbers<[1], [0], [0], [1], [0, 0, 1, 1], [], []>} : vector<8x16xbf16>, vector<16x256xbf16>, vector<8x256xf32> -> vector<8x256xf32>
    %cst_61 = arith.constant dense<0.000000e+00> : vector<8xf32>
    %162 = vector.multi_reduction <add>, %161, %cst_61 [1] : vector<8x256xf32> to vector<8xf32>
    %163 = vector.shape_cast %162 : vector<8xf32> to vector<8x1xf32>
    %cst_62 = arith.constant 2.560000e+02 : f32
    %164 = vector.broadcast %cst_62 : f32 to vector<8x1xf32>
    %165 = arith.divf %163, %164 : vector<8x1xf32>
    %166 = vector.broadcast %165 : vector<8x1xf32> to vector<8x256xf32>
    %167 = arith.subf %161, %166 : vector<8x256xf32>
    %168 = arith.mulf %167, %167 : vector<8x256xf32>
    %cst_63 = arith.constant dense<0.000000e+00> : vector<8xf32>
    %169 = vector.multi_reduction <add>, %168, %cst_63 [1] : vector<8x256xf32> to vector<8xf32>
    %170 = vector.shape_cast %169 : vector<8xf32> to vector<8x1xf32>
    %cst_64 = arith.constant 2.560000e+02 : f32
    %171 = vector.broadcast %cst_64 : f32 to vector<8x1xf32>
    %172 = arith.divf %170, %171 : vector<8x1xf32>
    %cst_65 = arith.constant 9.99999997E-7 : f32
    %173 = vector.broadcast %cst_65 : f32 to vector<8x1xf32>
    %174 = arith.addf %172, %173 : vector<8x1xf32>
    %175 = math.rsqrt %174 : vector<8x1xf32>
    %176 = arith.mulf %2, %175 : vector<8x1xf32>
    %177 = vector.broadcast %176 : vector<8x1xf32> to vector<8x256xf32>
    %178 = arith.mulf %167, %177 : vector<8x256xf32>
    %179 = vector.broadcast %3 : vector<8x1xf32> to vector<8x256xf32>
    %180 = arith.addf %178, %179 : vector<8x256xf32>
    %cst_66 = arith.constant 0.000000e+00 : f32
    %181 = vector.broadcast %cst_66 : f32 to vector<8x256xf32>
    %182 = arith.cmpf ogt, %180, %181 : vector<8x256xf32>
    %183 = math.exp %180 : vector<8x256xf32>
    %cst_67 = arith.constant 1.000000e+00 : f32
    %184 = vector.broadcast %cst_67 : f32 to vector<8x256xf32>
    %185 = arith.subf %183, %184 : vector<8x256xf32>
    %186 = arith.select %182, %180, %185 : vector<8x256xi1>, vector<8x256xf32>
    %c17_i32_68 = arith.constant 17 : i32
    %187 = tpu.dynamic_rotate %186 by %c17_i32_68 dim 1 : vector<8x256xf32>, i32 -> vector<8x256xf32>
    %188 = vector.extract_strided_slice %10 {offsets = [0, 0], sizes = [1, 256], strides = [1, 1]} : vector<9x256xf32> to vector<1x256xf32>
    %189 = vector.broadcast %188 : vector<1x256xf32> to vector<8x256xf32>
    %190 = arith.mulf %187, %189 : vector<8x256xf32>
    %c16_i32_69 = arith.constant 16 : i32
    %191 = tpu.dynamic_rotate %186 by %c16_i32_69 dim 1 : vector<8x256xf32>, i32 -> vector<8x256xf32>
    %192 = vector.extract_strided_slice %10 {offsets = [1, 0], sizes = [1, 256], strides = [1, 1]} : vector<9x256xf32> to vector<1x256xf32>
    %193 = vector.broadcast %192 : vector<1x256xf32> to vector<8x256xf32>
    %194 = arith.mulf %191, %193 : vector<8x256xf32>
    %c15_i32_70 = arith.constant 15 : i32
    %195 = tpu.dynamic_rotate %186 by %c15_i32_70 dim 1 : vector<8x256xf32>, i32 -> vector<8x256xf32>
    %196 = vector.extract_strided_slice %10 {offsets = [2, 0], sizes = [1, 256], strides = [1, 1]} : vector<9x256xf32> to vector<1x256xf32>
    %197 = vector.broadcast %196 : vector<1x256xf32> to vector<8x256xf32>
    %198 = arith.mulf %195, %197 : vector<8x256xf32>
    %c1_i32_71 = arith.constant 1 : i32
    %199 = tpu.dynamic_rotate %186 by %c1_i32_71 dim 1 : vector<8x256xf32>, i32 -> vector<8x256xf32>
    %200 = vector.extract_strided_slice %10 {offsets = [3, 0], sizes = [1, 256], strides = [1, 1]} : vector<9x256xf32> to vector<1x256xf32>
    %201 = vector.broadcast %200 : vector<1x256xf32> to vector<8x256xf32>
    %202 = arith.mulf %199, %201 : vector<8x256xf32>
    %c255_i32_72 = arith.constant 255 : i32
    %203 = tpu.dynamic_rotate %186 by %c255_i32_72 dim 1 : vector<8x256xf32>, i32 -> vector<8x256xf32>
    %204 = vector.extract_strided_slice %10 {offsets = [5, 0], sizes = [1, 256], strides = [1, 1]} : vector<9x256xf32> to vector<1x256xf32>
    %205 = vector.broadcast %204 : vector<1x256xf32> to vector<8x256xf32>
    %206 = arith.mulf %203, %205 : vector<8x256xf32>
    %c241_i32_73 = arith.constant 241 : i32
    %207 = tpu.dynamic_rotate %186 by %c241_i32_73 dim 1 : vector<8x256xf32>, i32 -> vector<8x256xf32>
    %208 = vector.extract_strided_slice %10 {offsets = [6, 0], sizes = [1, 256], strides = [1, 1]} : vector<9x256xf32> to vector<1x256xf32>
    %209 = vector.broadcast %208 : vector<1x256xf32> to vector<8x256xf32>
    %210 = arith.mulf %207, %209 : vector<8x256xf32>
    %c240_i32_74 = arith.constant 240 : i32
    %211 = tpu.dynamic_rotate %186 by %c240_i32_74 dim 1 : vector<8x256xf32>, i32 -> vector<8x256xf32>
    %212 = vector.extract_strided_slice %10 {offsets = [7, 0], sizes = [1, 256], strides = [1, 1]} : vector<9x256xf32> to vector<1x256xf32>
    %213 = vector.broadcast %212 : vector<1x256xf32> to vector<8x256xf32>
    %214 = arith.mulf %211, %213 : vector<8x256xf32>
    %c239_i32_75 = arith.constant 239 : i32
    %215 = tpu.dynamic_rotate %186 by %c239_i32_75 dim 1 : vector<8x256xf32>, i32 -> vector<8x256xf32>
    %216 = vector.extract_strided_slice %10 {offsets = [8, 0], sizes = [1, 256], strides = [1, 1]} : vector<9x256xf32> to vector<1x256xf32>
    %217 = vector.broadcast %216 : vector<1x256xf32> to vector<8x256xf32>
    %218 = arith.mulf %215, %217 : vector<8x256xf32>
    %219 = tpu.concatenate %190, %194, %198, %202, %186, %206, %210, %214, %218 in 0 : vector<8x256xf32>, vector<8x256xf32>, vector<8x256xf32>, vector<8x256xf32>, vector<8x256xf32>, vector<8x256xf32>, vector<8x256xf32>, vector<8x256xf32>, vector<8x256xf32> -> vector<72x256xf32>
    %220 = arith.truncf %219 : vector<72x256xf32> to vector<72x256xbf16>
    %cst_76 = arith.constant dense<0.000000e+00> : vector<8x256xf32>
    %221 = tpu.matmul %7, %220, %cst_76 {dimension_numbers = #tpu.dot_dimension_numbers<[1], [0], [0], [1], [0, 0, 1, 1], [], []>} : vector<8x72xbf16>, vector<72x256xbf16>, vector<8x256xf32> -> vector<8x256xf32>
    %cst_77 = arith.constant dense<0.000000e+00> : vector<8xf32>
    %222 = vector.multi_reduction <add>, %221, %cst_77 [1] : vector<8x256xf32> to vector<8xf32>
    %223 = vector.shape_cast %222 : vector<8xf32> to vector<8x1xf32>
    %cst_78 = arith.constant 2.560000e+02 : f32
    %224 = vector.broadcast %cst_78 : f32 to vector<8x1xf32>
    %225 = arith.divf %223, %224 : vector<8x1xf32>
    %226 = vector.broadcast %225 : vector<8x1xf32> to vector<8x256xf32>
    %227 = arith.subf %221, %226 : vector<8x256xf32>
    %228 = arith.mulf %227, %227 : vector<8x256xf32>
    %cst_79 = arith.constant dense<0.000000e+00> : vector<8xf32>
    %229 = vector.multi_reduction <add>, %228, %cst_79 [1] : vector<8x256xf32> to vector<8xf32>
    %230 = vector.shape_cast %229 : vector<8xf32> to vector<8x1xf32>
    %cst_80 = arith.constant 2.560000e+02 : f32
    %231 = vector.broadcast %cst_80 : f32 to vector<8x1xf32>
    %232 = arith.divf %230, %231 : vector<8x1xf32>
    %cst_81 = arith.constant 9.99999997E-7 : f32
    %233 = vector.broadcast %cst_81 : f32 to vector<8x1xf32>
    %234 = arith.addf %232, %233 : vector<8x1xf32>
    %235 = math.rsqrt %234 : vector<8x1xf32>
    %236 = arith.mulf %4, %235 : vector<8x1xf32>
    %237 = vector.broadcast %236 : vector<8x1xf32> to vector<8x256xf32>
    %238 = arith.mulf %227, %237 : vector<8x256xf32>
    %239 = vector.broadcast %5 : vector<8x1xf32> to vector<8x256xf32>
    %240 = arith.addf %238, %239 : vector<8x256xf32>
    %cst_82 = arith.constant 0.000000e+00 : f32
    %241 = vector.broadcast %cst_82 : f32 to vector<8x256xf32>
    %242 = arith.cmpf ogt, %240, %241 : vector<8x256xf32>
    %243 = math.exp %240 : vector<8x256xf32>
    %cst_83 = arith.constant 1.000000e+00 : f32
    %244 = vector.broadcast %cst_83 : f32 to vector<8x256xf32>
    %245 = arith.subf %243, %244 : vector<8x256xf32>
    %246 = arith.select %242, %240, %245 : vector<8x256xi1>, vector<8x256xf32>
    %247 = arith.truncf %246 : vector<8x256xf32> to vector<8x256xbf16>
    %cst_84 = arith.constant dense<0.000000e+00> : vector<16x256xf32>
    %248 = tpu.matmul %8, %247, %cst_84 {dimension_numbers = #tpu.dot_dimension_numbers<[1], [0], [0], [1], [0, 0, 1, 1], [], []>} : vector<16x8xbf16>, vector<8x256xbf16>, vector<16x256xf32> -> vector<16x256xf32>
    %c1_85 = arith.constant 1 : index
    %c0_86 = arith.constant 0 : index
    %c0_87 = arith.constant 0 : index
    %249 = vector.load %arg1[%c1_85, %c0_86, %c0_87] : memref<2x16x256xf32, #tpu.memory_space<vmem>>, vector<1x16x256xf32>
    %250 = vector.shape_cast %249 : vector<1x16x256xf32> to vector<16x256xf32>
    %251 = arith.addf %250, %248 : vector<16x256xf32>
    %c1_88 = arith.constant 1 : index
    %c0_89 = arith.constant 0 : index
    %c0_90 = arith.constant 0 : index
    %252 = vector.load %arg12[%c1_88, %c0_89, %c0_90] : memref<2x16x256xf32, #tpu.memory_space<vmem>>, vector<1x16x256xf32>
    %253 = vector.shape_cast %252 : vector<1x16x256xf32> to vector<16x256xf32>
    %254 = vector.shape_cast %251 : vector<16x256xf32> to vector<1x16x256xf32>
    tpu.vector_store %arg12[%c1_88, %c0_89, %c0_90], %254 {strides = array<i32>} : memref<2x16x256xf32, #tpu.memory_space<vmem>>, vector<1x16x256xf32>,
    return
  }
  func.func @transform_0(%arg0: i32) -> (i32, i32, i32) {
    %c0_i32 = arith.constant 0 : i32
    %c0_i32_0 = arith.constant 0 : i32
    %c0_i32_1 = arith.constant 0 : i32
    return %arg0, %c0_i32, %c0_i32_0 : i32, i32, i32
  }
  func.func @transform_1(%arg0: i32) -> (i32, i32) {
    %c0_i32 = arith.constant 0 : i32
    %c0_i32_0 = arith.constant 0 : i32
    %c0_i32_1 = arith.constant 0 : i32
    return %c0_i32, %c0_i32_0 : i32, i32
  }
  func.func @transform_2(%arg0: i32) -> (i32, i32) {
    %c0_i32 = arith.constant 0 : i32
    %c0_i32_0 = arith.constant 0 : i32
    %c0_i32_1 = arith.constant 0 : i32
    return %c0_i32, %c0_i32_0 : i32, i32
  }
  func.func @transform_3(%arg0: i32) -> (i32, i32) {
    %c0_i32 = arith.constant 0 : i32
    %c0_i32_0 = arith.constant 0 : i32
    %c0_i32_1 = arith.constant 0 : i32
    return %c0_i32, %c0_i32_0 : i32, i32
  }
  func.func @transform_4(%arg0: i32) -> (i32, i32) {
    %c0_i32 = arith.constant 0 : i32
    %c0_i32_0 = arith.constant 0 : i32
    %c0_i32_1 = arith.constant 0 : i32
    return %c0_i32, %c0_i32_0 : i32, i32
  }
  func.func @transform_5(%arg0: i32) -> (i32, i32) {
    %c0_i32 = arith.constant 0 : i32
    %c0_i32_0 = arith.constant 0 : i32
    %c0_i32_1 = arith.constant 0 : i32
    return %c0_i32, %c0_i32_0 : i32, i32
  }
  func.func @transform_6(%arg0: i32) -> (i32, i32) {
    %c0_i32 = arith.constant 0 : i32
    %c0_i32_0 = arith.constant 0 : i32
    %c0_i32_1 = arith.constant 0 : i32
    return %c0_i32, %c0_i32_0 : i32, i32
  }
  func.func @transform_7(%arg0: i32) -> (i32, i32) {
    %c0_i32 = arith.constant 0 : i32
    %c0_i32_0 = arith.constant 0 : i32
    %c0_i32_1 = arith.constant 0 : i32
    return %c0_i32, %c0_i32_0 : i32, i32
  }
  func.func @transform_8(%arg0: i32) -> (i32, i32) {
    %c0_i32 = arith.constant 0 : i32
    %c0_i32_0 = arith.constant 0 : i32
    %c0_i32_1 = arith.constant 0 : i32
    return %c0_i32, %c0_i32_0 : i32, i32
  }
  func.func @transform_9(%arg0: i32) -> (i32, i32) {
    %c0_i32 = arith.constant 0 : i32
    %c0_i32_0 = arith.constant 0 : i32
    %c0_i32_1 = arith.constant 0 : i32
    return %c0_i32, %c0_i32_0 : i32, i32
  }
  func.func @transform_10(%arg0: i32) -> (i32, i32) {
    %c0_i32 = arith.constant 0 : i32
    %c0_i32_0 = arith.constant 0 : i32
    %c0_i32_1 = arith.constant 0 : i32
    return %c0_i32, %c0_i32_0 : i32, i32
  }
  func.func @transform_11(%arg0: i32) -> (i32, i32, i32) {
    %c0_i32 = arith.constant 0 : i32
    %c0_i32_0 = arith.constant 0 : i32
    %c0_i32_1 = arith.constant 0 : i32
    return %arg0, %c0_i32, %c0_i32_0 : i32, i32, i32
  }
}

</mosaic_0001>

<bundles_post_ra>
// kernel: tpu_custom_call.1
= control target key start
LH: loop header
LB: loop body
LE: loop exit
PB: predicated region body
PF: predicated region fallthrough
CT: control target
= control target key end

     0   :  { %s1529_s0 = inlined_call_operand.vmem [shape: f32[2,16,256], index: 0, kind: input, shape index: {}]   ;;  %s1530_s1 = inlined_call_operand.vmem [shape: bf16[9,256], index: 1, kind: input, shape index: {}]   ;;  %s1531_s2 = inlined_call_operand.vmem [shape: f32[16,1], index: 2, kind: input, shape index: {}]   ;;  %s1532_s3 = inlined_call_operand.vmem [shape: f32[16,1], index: 3, kind: input, shape index: {}]   ;;  %s1533_s4 = inlined_call_operand.vmem [shape: bf16[8,16], index: 4, kind: input, shape index: {}]   ;;  %s1534_s5 = inlined_call_operand.vmem [shape: f32[8,1], index: 5, kind: input, shape index: {}]   ;;  %s1535_s6 = inlined_call_operand.vmem [shape: f32[8,1], index: 6, kind: input, shape index: {}]   ;;  %s1536_s7 = inlined_call_operand.vmem [shape: bf16[8,72], index: 7, kind: input, shape index: {}]   ;;  %s1537_s8 = inlined_call_operand.vmem [shape: f32[8,1], index: 8, kind: input, shape index: {}]   ;;  %s1538_s9 = inlined_call_operand.vmem [shape: f32[8,1], index: 9, kind: input, shape index: {}]   ;;  %s1539_s10 = inlined_call_operand.vmem [shape: bf16[16,8], index: 10, kind: input, shape index: {}]   ;;  %s1540_s11 = inlined_call_operand.hbm [shape: f32[2,16,256], index: 11, kind: output, shape index: {}]  }
   0x1   :  { %v1106_v0 = vld [vmem:[%s1529_s0] sm:$0xff]  ;;  %v1111_v1 = vld [vmem:[%s1529_s0 + $0x8] sm:$0xff]  ;;  %v1116_v2 = vld [vmem:[%s1529_s0 + $0x10] sm:$0xff] }
   0x2   :  { %v62_v3 = vadd.f32 %v1111_v1, %v1106_v0  ;;  %v1123_v4 = vld [vmem:[%s1529_s0 + $0x18] sm:$0xff] }
   0x3   :  { %16 = vsyncpa [#allocation3], 0  ;;  %v65_v5 = vadd.f32 %v1123_v4, %v1116_v2  ;;  %v42_v20 = vld [vmem:[%s1532_s3] sm:$0xff]  ;;  %v1032_v21 = vmov 0   ;;  %v1147_v31 = vld [vmem:[%s1531_s2 + $0x8] sm:$0xff]  ;;  %vm143_vm4 = vcmask 130048  }
   0x4   :  { %63 = vadd.xlane.f32.xlu0 %v62_v3  ;;  %958 = vset.pattern.permute.xlu1 %v1032_v21  ;;  %v1141_v28 = vld [vmem:[%s1531_s2] sm:$0xff]  ;;  %v43_v34 = vld [vmem:[%s1532_s3 + $0x8] sm:$0xff]  ;;  %s1035_s17 = smov 1   ;;  %s1036_s18 = smov 16   ;;  %vm379_vm15 = vcmask 1043456  }
   0x5   :  { %957 = vset.pattern.permute.xlu0 %v1032_v21  ;;  %179 = vmatprep.mubr.bf16.mxu1 %v1032_v21  ;;  %s1037_s19 = smov 127   ;;  %s1038_s20 = smov 113  }
   0x6   :  { %515 = vmatprep.mubr.bf16.mxu0 %v1032_v21  ;;  %s1039_s21 = smov 112   ;;  %s1040_s22 = smov 111  }
   0x8   :  { %66 = vadd.xlane.f32.xlu0 %v65_v5  ;;  %v1164_v5 = vld [vmem:[%s1533_s4] sm:$0xf] }
  0x91   :  { %v64_v6 = vpop.xlane.xlu0 %63 }
  0x92   :  { %v69_v7 = vmul.f32 0.00390625, %v64_v6 }
  0x94   :  { %v71_v8 = vsub.f32 %v1106_v0, %v69_v7  ;;  %v72_v9 = vsub.f32 %v1111_v1, %v69_v7 }
  0x95   :  { %v67_v10 = vpop.xlane.xlu0 %66 }
  0x96   :  { %v70_v11 = vmul.f32 0.00390625, %v67_v10  ;;  %v75_v12 = vmul.f32 %v71_v8, %v71_v8  ;;  %v76_v13 = vmul.f32 %v72_v9, %v72_v9 }
  0x98   :  { %v73_v14 = vsub.f32 %v1116_v2, %v70_v11  ;;  %v74_v15 = vsub.f32 %v1123_v4, %v70_v11  ;;  %v79_v16 = vadd.f32 %v76_v13, %v75_v12 }
  0x9a   :  { %80 = vadd.xlane.f32.xlu1 %v79_v16  ;;  %v77_v17 = vmul.f32 %v73_v14, %v73_v14  ;;  %v78_v18 = vmul.f32 %v74_v15, %v74_v15 }
  0x9c   :  { %v82_v19 = vadd.f32 %v78_v18, %v77_v17  ;;  %v45_v18 = vld [vmem:[%s1535_s6] sm:$0xff]  ;;  %s1034_s6 = smov 15  }
  0x9e   :  { %83 = vadd.xlane.f32.xlu1 %v82_v19 }
  0xaf   :  { %109 = vperm.xlu1 %958, %v42_v20  }
 0x127   :  { %v81_v22 = vpop.xlane.xlu1 %80 }
 0x128   :  { %v85_v23 = vmul.f32 0.00390625, %v81_v22 }
 0x12a   :  { %v87_v24 = vadd.f32 1e-06, %v85_v23  ;;  %v1175_v23 = vld [vmem:[%s1534_s5] sm:$0xff]  ;;  %s1033_s5 = smov 17  }
 0x12b   :  { %v84_v25 = vpop.xlane.xlu1 %83 }
 0x12c   :  { %960 = vrsqrt.f32 %v87_v24  ;;  %v86_v26 = vmul.f32 0.00390625, %v84_v25 }
 0x12e   :  { %v88_v27 = vadd.f32 1e-06, %v86_v26 }
 0x12f   :  { %v1153_v35 = vpop.permute.xlu1 %109 }
 0x130   :  { %962 = vrsqrt.f32 %v88_v27 }
 0x136   :  { %v961_v29 = vpop.eup %960 }
 0x137   :  { %v91_v30 = vmul.f32 %v961_v29, %v1141_v28 }
 0x139   :  { %95 = vperm.xlu0 %957, %v91_v30  }
 0x13a   :  { %v963_v32 = vpop.eup %962 }
 0x13b   :  { %v92_v33 = vmul.f32 %v963_v32, %v1147_v31 }
 0x13d   :  { %100 = vperm.xlu1 %958, %v92_v33  }
 0x141   :  { %114 = vperm.xlu1 %958, %v43_v34  }
 0x1b8   :  { %v96_v36 = vpop.permute.xlu0 %95 }
 0x1b9   :  { %v103_v37 = vmul.f32 %v96_v36, %v71_v8  ;;  %v104_v38 = vmul.f32 %v96_v36, %v72_v9 }
 0x1bb   :  { %v117_v39 = vadd.f32 %v1153_v35, %v103_v37  ;;  %v118_v40 = vadd.f32 %v1153_v35, %v104_v38 }
 0x1bc   :  { %v101_v41 = vpop.permute.xlu1 %100 }
 0x1bd   :  { %v127_v42 = vmul.f32 1.442695, %v118_v40  ;;  %v125_v43 = vmul.f32 1.442695, %v117_v39  ;;  %v105_v44 = vmul.f32 %v101_v41, %v73_v14  ;;  %v106_v45 = vmul.f32 %v101_v41, %v74_v15 }
 0x1be   :  { %vm122_vm0 = vcmp.gt.f32.partialorder %v118_v40, 0.0  ;;  %vm121_vm2 = vcmp.gt.f32.partialorder %v117_v39, 0.0 }
 0x1bf   :  { %964 = vpow2.f32 %v127_v42 }
 0x1c0   :  { %v1157_v46 = vpop.permute.xlu1 %114  ;;  %966 = vpow2.f32 %v125_v43  ;;  %v1221_v43 = vld [vmem:[%s1529_s0 + $0x20] sm:$0xff] }
 0x1c1   :  { %v119_v47 = vadd.f32 %v1157_v46, %v105_v44  ;;  %v120_v48 = vadd.f32 %v1157_v46, %v106_v45  ;;  %v1226_v44 = vld [vmem:[%s1529_s0 + $0x28] sm:$0xff] }
 0x1c2   :  { %v539_v45 = vadd.f32 %v1226_v44, %v1221_v43 }
 0x1c3   :  { %v131_v49 = vmul.f32 1.442695, %v120_v48  ;;  %v129_v50 = vmul.f32 1.442695, %v119_v47  ;;  %vm124_vm1 = vcmp.gt.f32.partialorder %v120_v48, 0.0  ;;  %vm123_vm3 = vcmp.gt.f32.partialorder %v119_v47, 0.0 }
 0x1c5   :  { %968 = vpow2.f32 %v131_v49 }
 0x1c6   :  { %970 = vpow2.f32 %v129_v50  ;;  %v52_v50 = vld [vmem:[%s1530_s1] sm:$0xff] }
 0x1c9   :  { %v965_v51 = vpop.eup %964 }
 0x1ca   :  { %v967_v52 = vpop.eup %966  ;;  %v916_v53 = vadd.f32 -1.0, %v965_v51 }
 0x1cb   :  { %v915_v55 = vadd.f32 -1.0, %v967_v52 }
 0x1cc   :  { %v138_v59 = vsel %vm122_vm0, %v118_v40, %v916_v53  ;;  %v1237_v53 = vunpack.c.l.bf16 %v52_v50  ;;  %vm375_vm0 = vcmask 588800  }
 0x1cd   :  { %v137_v62 = vsel %vm121_vm2, %v117_v39, %v915_v55 }
 0x1cf   :  { %v969_v54 = vpop.eup %968 }
 0x1d0   :  { %v971_v56 = vpop.eup %970  ;;  %v918_v57 = vadd.f32 -1.0, %v969_v54 }
 0x1d1   :  { %v917_v58 = vadd.f32 -1.0, %v971_v56  ;;  %v1242_v56 = vunpack.c.h.bf16 %v52_v50 }
 0x1d2   :  { %v140_v60 = vsel %vm124_vm1, %v120_v48, %v918_v57 }
 0x1d3   :  { %v142_v61 = vpack.c.bf16 %v140_v60, %v138_v59  ;;  %v139_v63 = vsel %vm123_vm3, %v119_v47, %v917_v58  ;;  %v231_v47 = vlaneseq }
 0x1d4   :  { %v141_v3 = vpack.c.bf16 %v139_v63, %v137_v62 }
 0x1d5   :  { %147 = vmatprep.subr.bf16.mxu1 %v142_v61  ;;  %v1230_v49 = vshrl.u32 %v231_v47, 7  ;;  %v1235_v51 = vand.u32 127, %v231_v47 }
 0x1d6   :  { %148 = vmatpush1.bf16.msra.mxu1 %v141_v3 }
 0x1d7   :  { %v1240_v54 = vsub.s32 0, %v1230_v49  ;;  %v255_v57 = vsub.s32 1, %v1230_v49  ;;  %vm233_vm7 = vcmp.lt.s32.totalorder %v1235_v51, 17  ;;  %vm250_vm8 = vcmp.lt.s32.totalorder %v1235_v51, 16 }
 0x1d8   :  { %vm267_vm9 = vcmp.lt.s32.totalorder %v1235_v51, 15  ;;  %vm284_vm10 = vcmp.lt.s32.totalorder %v1235_v51, 1  ;;  %vm301_vm11 = vcmp.lt.s32.totalorder %v1235_v51, 127  ;;  %vm318_vm12 = vcmp.lt.s32.totalorder %v1235_v51, 113 }
 0x1d9   :  { %919 = vmatmul.mubr.msk.bf16.vlgmr.msra.gmra.mrb[0].mxu1 %vm143_vm4, %v1164_v5  ;;  %v1248_v59 = vrot.slane %v1237_v53, %v1240_v54  ;;  %v1252_v60 = vrot.slane %v1242_v56, %v1240_v54  ;;  %v1256_v61 = vrot.slane %v1237_v53, %v255_v57  ;;  %v1259_v62 = vrot.slane %v1242_v56, %v255_v57 }
 0x1da   :  { %418 = vmatprep.mubr.bf16.mxu1 %v1032_v21  ;;  %vm335_vm13 = vcmp.lt.s32.totalorder %v1235_v51, 112  ;;  %vm352_vm14 = vcmp.lt.s32.totalorder %v1235_v51, 111 }
 0x2ac   :  { %v181_v6 = vpop.f32.mrb[0].mxu1 }
 0x2ad   :  { %v183_v7 = vpop.f32.mrb[1].mxu1 }
 0x2ae   :  { %v185_v8 = vpop.f32.mrb[2].mxu1  ;;  %v188_v9 = vadd.f32 %v183_v7, %v181_v6 }
 0x2af   :  { %v186_v10 = vpop.f32.mrb[3].mxu1 }
 0x2b0   :  { %189 = vadd.xlane.f32.xlu1 %v188_v9  ;;  %v272_v10 = vsub.s32 2, %v1230_v49 }
 0x33d   :  { %v190_v11 = vpop.xlane.xlu1 %189 }
 0x33e   :  { %v191_v12 = vmul.f32 0.00390625, %v190_v11  ;;  %v289_v11 = vsub.s32 3, %v1230_v49 }
 0x340   :  { %v192_v13 = vsub.f32 %v181_v6, %v191_v12  ;;  %v193_v14 = vsub.f32 %v183_v7, %v191_v12 }
 0x342   :  { %v194_v15 = vmul.f32 %v192_v13, %v192_v13  ;;  %v195_v16 = vmul.f32 %v193_v14, %v193_v14 }
 0x344   :  { %v196_v17 = vadd.f32 %v195_v16, %v194_v15 }
 0x346   :  { %197 = vadd.xlane.f32.xlu0 %v196_v17 }
 0x35c   :  { %212 = vperm.xlu0 %957, %v45_v18  }
 0x3d3   :  { %v198_v19 = vpop.xlane.xlu0 %197 }
 0x3d4   :  { %v199_v20 = vmul.f32 0.00390625, %v198_v19  ;;  %v1277_v19 = vrot.slane %v1237_v53, %v272_v10 }
 0x3d6   :  { %v200_v22 = vadd.f32 1e-06, %v199_v20  ;;  %v306_v20 = vsub.s32 5, %v1230_v49 }
 0x3d8   :  { %972 = vrsqrt.f32 %v200_v22 }
 0x3db   :  { %v1178_v30 = vpop.permute.xlu0 %212 }
 0x3e2   :  { %v973_v24 = vpop.eup %972 }
 0x3e3   :  { %v202_v25 = vmul.f32 %v973_v24, %v1175_v23  ;;  %v1281_v24 = vrot.slane %v1242_v56, %v272_v10 }
 0x3e5   :  { %205 = vperm.xlu1 %958, %v202_v25   ;;  %v1285_v25 = vrot.slane %v1237_v53, %v289_v11 }
 0x464   :  { %v206_v26 = vpop.permute.xlu1 %205 }
 0x465   :  { %v208_v27 = vmul.f32 %v206_v26, %v192_v13  ;;  %v209_v29 = vmul.f32 %v206_v26, %v193_v14  ;;  %v1288_v26 = vrot.slane %v1242_v56, %v289_v11 }
 0x467   :  { %v215_v32 = vadd.f32 %v1178_v30, %v208_v27  ;;  %v216_v33 = vadd.f32 %v1178_v30, %v209_v29 }
 0x469   :  { %v219_v34 = vmul.f32 1.442695, %v215_v32  ;;  %v221_v36 = vmul.f32 1.442695, %v216_v33  ;;  %vm217_vm5 = vcmp.gt.f32.partialorder %v215_v32, 0.0  ;;  %vm218_vm6 = vcmp.gt.f32.partialorder %v216_v33, 0.0 }
 0x46b   :  { %974 = vpow2.f32 %v219_v34 }
 0x46c   :  { %976 = vpow2.f32 %v221_v36  ;;  %v1300_v36 = vrot.slane %v1237_v53, %v306_v20 }
 0x475   :  { %v975_v37 = vpop.eup %974 }
 0x476   :  { %v977_v38 = vpop.eup %976  ;;  %v920_v39 = vadd.f32 -1.0, %v975_v37  ;;  %v1303_v37 = vrot.slane %v1242_v56, %v306_v20 }
 0x477   :  { %v921_v40 = vadd.f32 -1.0, %v977_v38 }
 0x478   :  { %v1182_v41 = vsel %vm217_vm5, %v215_v32, %v920_v39 }
 0x479   :  { %v1184_v42 = vsel %vm218_vm6, %v216_v33, %v921_v40  ;;  %227 = vrot.lane.b32.xlu1 %v1182_v41, %s1033_s5 }
 0x47a   :  { %265 = vrot.lane.b32.xlu0 %v1184_v42, %s1034_s6 }
 0x47d   :  { %229 = vrot.lane.b32.xlu1 %v1184_v42, %s1033_s5 }
 0x47e   :  { %282 = vrot.lane.b32.xlu0 %v1184_v42, %s1035_s17 }
 0x481   :  { %246 = vrot.lane.b32.xlu1 %v1182_v41, %s1036_s18 }
 0x482   :  { %299 = vrot.lane.b32.xlu0 %v1184_v42, %s1037_s19 }
 0x485   :  { %248 = vrot.lane.b32.xlu1 %v1184_v42, %s1036_s18 }
 0x486   :  { %316 = vrot.lane.b32.xlu0 %v1184_v42, %s1038_s20 }
 0x489   :  { %263 = vrot.lane.b32.xlu1 %v1182_v41, %s1034_s6 }
 0x48a   :  { %333 = vrot.lane.b32.xlu0 %v1184_v42, %s1039_s21 }
 0x48d   :  { %280 = vrot.lane.b32.xlu1 %v1182_v41, %s1035_s17 }
 0x48e   :  { %350 = vrot.lane.b32.xlu0 %v1184_v42, %s1040_s22 }
 0x491   :  { %297 = vrot.lane.b32.xlu1 %v1182_v41, %s1037_s19 }
 0x495   :  { %314 = vrot.lane.b32.xlu1 %v1182_v41, %s1038_s20 }
 0x499   :  { %331 = vrot.lane.b32.xlu1 %v1182_v41, %s1039_s21 }
 0x49d   :  { %348 = vrot.lane.b32.xlu1 %v1182_v41, %s1040_s22 }
 0x4ad   :  { %540 = vadd.xlane.f32.xlu0 %v539_v45 }
 0x4eb   :  { %v228_v48 = vpop.permute.xlu1 %227 }
 0x4ec   :  { %v266_v55 = vpop.permute.xlu0 %265 }
 0x4ef   :  { %v230_v52 = vpop.permute.xlu1 %229 }
 0x4f0   :  { %v234_v63 = vsel %vm233_vm7, %v228_v48, %v230_v52  ;;  %v235_v3 = vsel %vm233_vm7, %v230_v52, %v228_v48  ;;  %v283_v6 = vpop.permute.xlu0 %282 }
 0x4f1   :  { %v244_v12 = vmul.f32 %v1248_v59, %v235_v3  ;;  %v245_v13 = vmul.f32 %v1252_v60, %v234_v63 }
 0x4f3   :  { %v247_v58 = vpop.permute.xlu1 %246 }
 0x4f4   :  { %v300_v22 = vpop.permute.xlu0 %299 }
 0x4f7   :  { %v249_v7 = vpop.permute.xlu1 %248 }
 0x4f8   :  { %v251_v8 = vsel %vm250_vm8, %v247_v58, %v249_v7  ;;  %v252_v9 = vsel %vm250_vm8, %v249_v7, %v247_v58  ;;  %v317_v47 = vpop.permute.xlu0 %316  ;;  %v323_v58 = vsub.s32 6, %v1230_v49  ;;  %v53_v7 = vld [vmem:[%s1530_s1 + $0x8] sm:$0x11] }
 0x4f9   :  { %v261_v14 = vmul.f32 %v1256_v61, %v252_v9  ;;  %v262_v15 = vmul.f32 %v1259_v62, %v251_v8 }
 0x4fa   :  { %v1324_v11 = vrot.slane %v1237_v53, %v323_v58 }
 0x4fb   :  { %v365_v16 = vpack.c.bf16 %v261_v14, %v244_v12  ;;  %v264_v17 = vpop.permute.xlu1 %263  ;;  %v366_v18 = vpack.c.bf16 %v262_v15, %v245_v13  ;;  %v56_v12 = vunpack.c.l.bf16 %v53_v7  ;;  %v57_v13 = vunpack.c.h.bf16 %v53_v7 }
 0x4fc   :  { %v268_v27 = vsel %vm267_vm9, %v264_v17, %v266_v55  ;;  %v269_v29 = vsel %vm267_vm9, %v266_v55, %v264_v17  ;;  %v334_v14 = vpop.permute.xlu0 %333 }
 0x4fd   :  { %386 = vmatprep.subr.bf16.mxu1 %v366_v18  ;;  %v278_v38 = vmul.f32 %v1277_v19, %v269_v29  ;;  %v279_v39 = vmul.f32 %v1281_v24, %v268_v27  ;;  %v1346_v20 = vrot.slane %v56_v12, %v1240_v54 }
 0x4fe   :  { %387 = vmatpush1.bf16.msra.mxu1 %v365_v16 }
 0x4ff   :  { %v281_v32 = vpop.permute.xlu1 %280 }
 0x500   :  { %v285_v33 = vsel %vm284_vm10, %v281_v32, %v283_v6  ;;  %v286_v34 = vsel %vm284_vm10, %v283_v6, %v281_v32  ;;  %v340_v6 = vsub.s32 7, %v1230_v49  ;;  %v1327_v49 = vrot.slane %v1242_v56, %v323_v58  ;;  %v1379_v58 = vld [vmem:[%s1529_s0 + $0x38] sm:$0xff] }
 0x501   :  { %v295_v40 = vmul.f32 %v1285_v25, %v286_v34  ;;  %v296_v45 = vmul.f32 %v1288_v26, %v285_v33  ;;  %v351_v33 = vpop.permute.xlu0 %350 }
 0x502   :  { %v1331_v15 = vrot.slane %v1237_v53, %v340_v6 }
 0x503   :  { %v367_v48 = vpack.c.bf16 %v295_v40, %v278_v38  ;;  %v298_v50 = vpop.permute.xlu1 %297  ;;  %v368_v52 = vpack.c.bf16 %v296_v45, %v279_v39 }
 0x504   :  { %v302_v55 = vsel %vm301_vm11, %v298_v50, %v300_v22  ;;  %v303_v57 = vsel %vm301_vm11, %v300_v22, %v298_v50 }
 0x505   :  { %v312_v63 = vmul.f32 %v1300_v36, %v302_v55  ;;  %v313_v3 = vmul.f32 %v1303_v37, %v303_v57  ;;  %388 = vmatprep.subr.bf16.mxu1 %v368_v52  ;;  %v1366_v55 = vld [vmem:[%s1536_s7] sm:$0xf]  ;;  %v1374_v57 = vld [vmem:[%s1529_s0 + $0x30] sm:$0xff] }
 0x506   :  { %389 = vmatpush1.bf16.msra.mxu1 %v367_v48 }
 0x507   :  { %v369_v8 = vpack.c.bf16 %v312_v63, %v1182_v41  ;;  %v315_v9 = vpop.permute.xlu1 %314  ;;  %v370_v10 = vpack.c.bf16 %v313_v3, %v1184_v42  ;;  %v1334_v41 = vrot.slane %v1242_v56, %v340_v6  ;;  %v1349_v56 = vrot.slane %v57_v13, %v1240_v54 }
 0x508   :  { %v319_v42 = vsel %vm318_vm12, %v315_v9, %v317_v47  ;;  %v320_v16 = vsel %vm318_vm12, %v317_v47, %v315_v9  ;;  %v542_v3 = vadd.f32 %v1379_v58, %v1374_v57 }
 0x509   :  { %390 = vmatprep.subr.bf16.mxu1 %v370_v10  ;;  %v329_v22 = vmul.f32 %v1324_v11, %v319_v42  ;;  %v330_v27 = vmul.f32 %v1327_v49, %v320_v16 }
 0x50a   :  { %391 = vmatpush1.bf16.msra.mxu1 %v369_v8  ;;  %543 = vadd.xlane.f32.xlu0 %v542_v3  ;;  %v47_v3 = vld [vmem:[%s1538_s9] sm:$0xff] }
 0x50b   :  { %v332_v17 = vpop.permute.xlu1 %331 }
 0x50c   :  { %v336_v18 = vsel %vm335_vm13, %v332_v17, %v334_v14  ;;  %v337_v53 = vsel %vm335_vm13, %v334_v14, %v332_v17 }
 0x50d   :  { %v346_v29 = vmul.f32 %v1331_v15, %v336_v18  ;;  %v347_v32 = vmul.f32 %v1334_v41, %v337_v53 }
 0x50f   :  { %v371_v34 = vpack.c.bf16 %v346_v29, %v329_v22  ;;  %v349_v38 = vpop.permute.xlu1 %348  ;;  %v372_v39 = vpack.c.bf16 %v347_v32, %v330_v27 }
 0x510   :  { %v353_v40 = vsel %vm352_vm14, %v349_v38, %v351_v33  ;;  %v354_v45 = vsel %vm352_vm14, %v351_v33, %v349_v38 }
 0x511   :  { %v363_v54 = vmul.f32 %v1346_v20, %v353_v40  ;;  %v364_v47 = vmul.f32 %v1349_v56, %v354_v45  ;;  %392 = vmatprep.subr.bf16.mxu1 %v372_v39 }
 0x512   :  { %393 = vmatpush1.bf16.msra.mxu1 %v371_v34 }
 0x513   :  { %v373_v48 = vpack.c.bf16 %v363_v54, %v363_v54  ;;  %v374_v50 = vpack.c.bf16 %v364_v47, %v364_v47 }
 0x515   :  { %922 = vmatprep.subr.msk.bf16.mxu1 %vm379_vm15, %v374_v50  ;;  %v381_v52 = vsel %vm379_vm15, %v373_v48, 0 }
 0x516   :  { %395 = vmatpush1.bf16.msra.mxu1 %v381_v52 }
 0x519   :  { %923 = vmatmul.mubr.msk.bf16.vlgmr.msra.gmra.mrb[4].mxu1 %vm375_vm0, %v1366_v55 }
 0x51a   :  { %879 = vmatprep.mubr.bf16.mxu1 %v1032_v21 }
 0x53a   :  { %v541_v63 = vpop.xlane.xlu0 %540 }
 0x53b   :  { %v545_v6 = vmul.f32 0.00390625, %v541_v63 }
 0x53d   :  { %v547_v7 = vsub.f32 %v1221_v43, %v545_v6  ;;  %v548_v8 = vsub.f32 %v1226_v44, %v545_v6 }
 0x53f   :  { %v551_v9 = vmul.f32 %v547_v7, %v547_v7  ;;  %v552_v10 = vmul.f32 %v548_v8, %v548_v8 }
 0x541   :  { %v555_v12 = vadd.f32 %v552_v10, %v551_v9 }
 0x543   :  { %556 = vadd.xlane.f32.xlu0 %v555_v12 }
 0x597   :  { %v544_v18 = vpop.xlane.xlu0 %543 }
 0x598   :  { %v546_v53 = vmul.f32 0.00390625, %v544_v18 }
 0x59a   :  { %v549_v29 = vsub.f32 %v1374_v57, %v546_v53  ;;  %v550_v32 = vsub.f32 %v1379_v58, %v546_v53 }
 0x59c   :  { %v553_v40 = vmul.f32 %v549_v29, %v549_v29  ;;  %v554_v45 = vmul.f32 %v550_v32, %v550_v32 }
 0x59e   :  { %v558_v48 = vadd.f32 %v554_v45, %v553_v40 }
 0x5d0   :  { %v557_v54 = vpop.xlane.xlu0 %556 }
 0x5d1   :  { %v561_v50 = vmul.f32 0.00390625, %v557_v54 }
 0x5d3   :  { %v563_v52 = vadd.f32 1e-06, %v561_v50 }
 0x5d5   :  { %978 = vrsqrt.f32 %v563_v52 }
 0x5df   :  { %v979_v63 = vpop.eup %978 }
 0x5e0   :  { %v567_v6 = vmul.f32 %v979_v63, %v1141_v28 }
 0x5ec   :  { %v420_v13 = vpop.f32.mrb[4].mxu1 }
 0x5ed   :  { %v422_v14 = vpop.f32.mrb[5].mxu1 }
 0x5ee   :  { %v424_v42 = vpop.f32.mrb[6].mxu1  ;;  %v427_v16 = vadd.f32 %v422_v14, %v420_v13 }
 0x5ef   :  { %v425_v17 = vpop.f32.mrb[7].mxu1 }
 0x5f0   :  { %428 = vadd.xlane.f32.xlu1 %v427_v16  ;;  %v1394_v16 = vld [vmem:[%s1537_s8] sm:$0xff] }
 0x67d   :  { %v429_v22 = vpop.xlane.xlu1 %428 }
 0x67e   :  { %v430_v27 = vmul.f32 0.00390625, %v429_v22 }
 0x680   :  { %v431_v33 = vsub.f32 %v420_v13, %v430_v27  ;;  %v432_v34 = vsub.f32 %v422_v14, %v430_v27 }
 0x682   :  { %v433_v38 = vmul.f32 %v431_v33, %v431_v33  ;;  %v434_v39 = vmul.f32 %v432_v34, %v432_v34 }
 0x684   :  { %v435_v47 = vadd.f32 %v434_v39, %v433_v38 }
 0x686   :  { %436 = vadd.xlane.f32.xlu1 %v435_v47 }
 0x68a   :  { %559 = vadd.xlane.f32.xlu1 %v558_v48 }
 0x69b   :  { %451 = vperm.xlu1 %958, %v47_v3  }
 0x69f   :  { %571 = vperm.xlu1 %958, %v567_v6  }
 0x713   :  { %v437_v9 = vpop.xlane.xlu1 %436 }
 0x714   :  { %v438_v10 = vmul.f32 0.00390625, %v437_v9 }
 0x716   :  { %v439_v12 = vadd.f32 1e-06, %v438_v10 }
 0x717   :  { %v560_v13 = vpop.xlane.xlu1 %559 }
 0x718   :  { %980 = vrsqrt.f32 %v439_v12  ;;  %v562_v14 = vmul.f32 0.00390625, %v560_v13 }
 0x71a   :  { %v564_v42 = vadd.f32 1e-06, %v562_v14 }
 0x71b   :  { %v1398_v22 = vpop.permute.xlu1 %451 }
 0x71c   :  { %982 = vrsqrt.f32 %v564_v42 }
 0x71f   :  { %v572_v27 = vpop.permute.xlu1 %571 }
 0x720   :  { %v579_v38 = vmul.f32 %v572_v27, %v547_v7  ;;  %v580_v39 = vmul.f32 %v572_v27, %v548_v8 }
 0x722   :  { %v981_v17 = vpop.eup %980  ;;  %v583_v40 = vadd.f32 %v579_v38, %v1153_v35  ;;  %v584_v45 = vadd.f32 %v580_v39, %v1153_v35 }
 0x723   :  { %v441_v18 = vmul.f32 %v981_v17, %v1394_v16 }
 0x724   :  { %v591_v54 = vmul.f32 1.442695, %v583_v40  ;;  %v593_v52 = vmul.f32 1.442695, %v584_v45  ;;  %vm587_vm3 = vcmp.gt.f32.partialorder %v583_v40, 0.0  ;;  %vm588_vm6 = vcmp.gt.f32.partialorder %v584_v45, 0.0 }
 0x725   :  { %444 = vperm.xlu0 %957, %v441_v18  }
 0x726   :  { %v983_v53 = vpop.eup %982  ;;  %984 = vpow2.f32 %v591_v54 }
 0x727   :  { %v568_v28 = vmul.f32 %v983_v53, %v1147_v31  ;;  %986 = vpow2.f32 %v593_v52 }
 0x729   :  { %576 = vperm.xlu0 %957, %v568_v28  }
 0x730   :  { %v985_v12 = vpop.eup %984 }
 0x731   :  { %v987_v13 = vpop.eup %986 }
 0x732   :  { %v934_v38 = vadd.f32 -1.0, %v987_v13 }
 0x7a4   :  { %v445_v47 = vpop.permute.xlu0 %444 }
 0x7a5   :  { %v447_v48 = vmul.f32 %v445_v47, %v431_v33  ;;  %v448_v50 = vmul.f32 %v445_v47, %v432_v34 }
 0x7a7   :  { %v454_v63 = vadd.f32 %v1398_v22, %v447_v48  ;;  %v455_v3 = vadd.f32 %v1398_v22, %v448_v50 }
 0x7a8   :  { %v577_v31 = vpop.permute.xlu0 %576 }
 0x7a9   :  { %v458_v6 = vmul.f32 1.442695, %v454_v63  ;;  %v460_v9 = vmul.f32 1.442695, %v455_v3  ;;  %v581_v10 = vmul.f32 %v577_v31, %v549_v29  ;;  %v582_v7 = vmul.f32 %v577_v31, %v550_v32 }
 0x7aa   :  { %vm456_vm1 = vcmp.gt.f32.partialorder %v454_v63, 0.0  ;;  %v933_v29 = vadd.f32 -1.0, %v985_v12  ;;  %vm457_vm2 = vcmp.gt.f32.partialorder %v455_v3, 0.0 }
 0x7ab   :  { %988 = vpow2.f32 %v458_v6  ;;  %v585_v8 = vadd.f32 %v581_v10, %v1157_v46  ;;  %v586_v35 = vadd.f32 %v582_v7, %v1157_v46 }
 0x7ac   :  { %990 = vpow2.f32 %v460_v9  ;;  %v603_v50 = vsel %vm587_vm3, %v583_v40, %v933_v29 }
 0x7ad   :  { %v595_v33 = vmul.f32 1.442695, %v585_v8  ;;  %v597_v34 = vmul.f32 1.442695, %v586_v35  ;;  %vm589_vm5 = vcmp.gt.f32.partialorder %v585_v8, 0.0 }
 0x7af   :  { %992 = vpow2.f32 %v595_v33 }
 0x7b0   :  { %994 = vpow2.f32 %v597_v34 }
 0x7b5   :  { %v989_v14 = vpop.eup %988 }
 0x7b6   :  { %v991_v42 = vpop.eup %990  ;;  %v924_v17 = vadd.f32 -1.0, %v989_v14 }
 0x7b7   :  { %v925_v18 = vadd.f32 -1.0, %v991_v42 }
 0x7b8   :  { %v464_v32 = vsel %vm456_vm1, %v454_v63, %v924_v17  ;;  %v1411_v63 = vld [vmem:[%s1539_s10] sm:$0xff]   ;;  %vm590_vm1 = vcmp.gt.f32.partialorder %v586_v35, 0.0  ;;  %s1041_s10 = smov [#allocation2]  }
 0x7b9   :  { %v993_v53 = vpop.eup %992  ;;  %v465_v28 = vsel %vm457_vm2, %v455_v3, %v925_v18  ;;  %v466_v27 = vpack.c.bf16 %v464_v32, %v464_v32  ;;  %vm473_vm2 = vcmask 64512   ;;  %v604_v3 = vsel %vm588_vm6, %v584_v45, %v934_v38  ;;  %s904_s16 = sshll.u32 %s1041_s10, 4  ;;  %s905_s16 = int_to_ptr.vmem [resolvable:$true] %s904_s16 }
 0x7ba   :  { %v995_v46 = vpop.eup %994  ;;  %v935_v39 = vadd.f32 -1.0, %v993_v53  ;;  %v467_v54 = vpack.c.bf16 %v465_v28, %v465_v28  ;;  %p1013_p1 = scmp.lt.s32.totalorder %s905_s16, %s905_s16 }
 0x7bb   :  { %v478_v47 = vsel %vm379_vm15, %v466_v27, 0  ;;  %v936_v48 = vadd.f32 -1.0, %v995_v46 }
 0x7bc   :  { %v605_v52 = vsel %vm589_vm5, %v585_v8, %v935_v39  ;;  %927 = vmatprep.subr.msk.bf16.mxu0 %vm379_vm15, %v467_v54 }
 0x7bd   :  { %484 = vmatpush1.bf16.msra.mxu0 %v478_v47  ;;  %v606_v31 = vsel %vm590_vm1, %v586_v35, %v936_v48  ;;  %v607_v6 = vpack.c.bf16 %v605_v52, %v603_v50 }
 0x7be   :  { %v608_v9 = vpack.c.bf16 %v606_v31, %v604_v3 }
 0x7c0   :  { %928 = vmatmul.mubr.msk.bf16.vlgmr.msra.gmra.mrb[0].mxu0 %vm473_vm2, %v1411_v63  ;;  %609 = vmatprep.subr.bf16.mxu0 %v608_v9 }
 0x7c1   :  { %610 = vmatpush1.bf16.msra.mxu0 %v607_v6  ;;  %641 = vmatprep.mubr.bf16.mxu0 %v1032_v21 }
 0x7c8   :  { %937 = vmatmul.mubr.msk.bf16.vlgmr.msra.gmra.mrb[4].mxu0 %vm143_vm4, %v1164_v5 }
 0x7c9   :  { %796 = vmatprep.mubr.bf16.mxu0 %v1032_v21 }
 0x893   :  { %v517_v40 = vpop.f32.mrb[0].mxu0 }
 0x894   :  { %v526_v10 = vadd.f32 %v517_v40, %v1106_v0  ;;  %v519_v7 = vpop.f32.mrb[1].mxu0 }
 0x895   :  { %v527_v45 = vadd.f32 %v519_v7, %v1111_v1  ;;  %v521_v8 = vpop.f32.mrb[2].mxu0 }
 0x896   :  { %530 = vst [vmem:[#allocation2] sm:$0xff] %v526_v10  ;;  %v528_v35 = vadd.f32 %v521_v8, %v1116_v2  ;;  %v523_v33 = vpop.f32.mrb[3].mxu0 }
 0x897   :  { %531 = vst [vmem:[#allocation2 + $0x8] sm:$0xff] %v527_v45  ;;  %v529_v34 = vadd.f32 %v523_v33, %v1123_v4 }
 0x898   :  { %532 = vst [vmem:[#allocation2 + $0x10] sm:$0xff] %v528_v35 }
 0x899   :  { %533 = vst [vmem:[#allocation2 + $0x18] sm:$0xff] %v529_v34 }
 0x89b   :  { %v643_v12 = vpop.f32.mrb[4].mxu0 }
 0x89c   :  { %v645_v5 = vpop.f32.mrb[5].mxu0 }
 0x89d   :  { %v647_v13 = vpop.f32.mrb[6].mxu0  ;;  %v650_v21 = vadd.f32 %v645_v5, %v643_v12 }
 0x89e   :  { %v648_v14 = vpop.f32.mrb[7].mxu0 }
 0x89f   :  { %651 = vadd.xlane.f32.xlu1 %v650_v21 }
 0x92c   :  { %v652_v0 = vpop.xlane.xlu1 %651 }
 0x92d   :  { %v653_v42 = vmul.f32 0.00390625, %v652_v0 }
 0x92f   :  { %v654_v17 = vsub.f32 %v643_v12, %v653_v42  ;;  %v655_v1 = vsub.f32 %v645_v5, %v653_v42 }
 0x931   :  { %v656_v18 = vmul.f32 %v654_v17, %v654_v17  ;;  %v657_v29 = vmul.f32 %v655_v1, %v655_v1 }
 0x933   :  { %v658_v32 = vadd.f32 %v657_v29, %v656_v18 }
 0x935   :  { %659 = vadd.xlane.f32.xlu0 %v658_v32 }
 0x9c2   :  { %v660_v2 = vpop.xlane.xlu0 %659 }
 0x9c3   :  { %v661_v53 = vmul.f32 0.00390625, %v660_v2 }
 0x9c5   :  { %v662_v28 = vadd.f32 1e-06, %v661_v53 }
 0x9c7   :  { %996 = vrsqrt.f32 %v662_v28 }
 0x9d1   :  { %v997_v4 = vpop.eup %996 }
 0x9d2   :  { %v664_v27 = vmul.f32 %v997_v4, %v1175_v23 }
 0x9d4   :  { %667 = vperm.xlu0 %957, %v664_v27  }
 0xa53   :  { %v668_v38 = vpop.permute.xlu0 %667 }
 0xa54   :  { %v670_v46 = vmul.f32 %v668_v38, %v654_v17  ;;  %v671_v39 = vmul.f32 %v668_v38, %v655_v1 }
 0xa56   :  { %v672_v54 = vadd.f32 %v670_v46, %v1178_v30  ;;  %v673_v47 = vadd.f32 %v671_v39, %v1178_v30 }
 0xa58   :  { %v676_v48 = vmul.f32 1.442695, %v672_v54  ;;  %v678_v50 = vmul.f32 1.442695, %v673_v47  ;;  %vm674_vm4 = vcmp.gt.f32.partialorder %v672_v54, 0.0  ;;  %vm675_vm3 = vcmp.gt.f32.partialorder %v673_v47, 0.0 }
 0xa5a   :  { %998 = vpow2.f32 %v676_v48 }
 0xa5b   :  { %1000 = vpow2.f32 %v678_v50 }
 0xa64   :  { %v999_v52 = vpop.eup %998 }
 0xa65   :  { %v1001_v3 = vpop.eup %1000  ;;  %v938_v31 = vadd.f32 -1.0, %v999_v52 }
 0xa66   :  { %v939_v6 = vadd.f32 -1.0, %v1001_v3 }
 0xa67   :  { %v1426_v9 = vsel %vm674_vm4, %v672_v54, %v938_v31 }
 0xa68   :  { %692 = vrot.lane.b32.xlu0 %v1426_v9, %s1036_s18  ;;  %684 = vrot.lane.b32.xlu1 %v1426_v9, %s1033_s5  ;;  %v683_v23 = vsel %vm675_vm3, %v673_v47, %v939_v6 }
 0xa6c   :  { %700 = vrot.lane.b32.xlu0 %v1426_v9, %s1034_s6  ;;  %686 = vrot.lane.b32.xlu1 %v683_v23, %s1033_s5  ;;  %s1008_s5 = scalar_lea.vmem %s905_s16, 1024 }
 0xa6d   :  { %p1009_p0 = scmp.ne.s32.totalorder %s905_s16, %s1008_s5  ;;  %p1014_p2 = scmp.lt.s32.totalorder %s1008_s5, %s1008_s5 }
 0xa6f   :  { %p1015_p3 = por %p1014_p2, %p1013_p1 }
 0xa70   :  { %708 = vrot.lane.b32.xlu0 %v1426_v9, %s1035_s17  ;;  %694 = vrot.lane.b32.xlu1 %v683_v23, %s1036_s18 }
 0xa71   :  { %p1016_p4 = pnand %p1015_p3, %p1009_p0 }
 0xa74   :  { %716 = vrot.lane.b32.xlu0 %v1426_v9, %s1037_s19  ;;  %702 = vrot.lane.b32.xlu1 %v683_v23, %s1034_s6 }
 0xa78   :  { %724 = vrot.lane.b32.xlu0 %v1426_v9, %s1038_s20  ;;  %710 = vrot.lane.b32.xlu1 %v683_v23, %s1035_s17 }
 0xa7c   :  { %732 = vrot.lane.b32.xlu0 %v1426_v9, %s1039_s21  ;;  %718 = vrot.lane.b32.xlu1 %v683_v23, %s1037_s19 }
 0xa80   :  { %740 = vrot.lane.b32.xlu0 %v1426_v9, %s1040_s22  ;;  %726 = vrot.lane.b32.xlu1 %v683_v23, %s1038_s20 }
 0xa84   :  { %734 = vrot.lane.b32.xlu1 %v683_v23, %s1039_s21 }
 0xa88   :  { %742 = vrot.lane.b32.xlu1 %v683_v23, %s1040_s22 }
 0xada   :  { %v693_v30 = vpop.permute.xlu0 %692  ;;  %v685_v40 = vpop.permute.xlu1 %684 }
 0xade   :  { %v701_v10 = vpop.permute.xlu0 %700  ;;  %v687_v7 = vpop.permute.xlu1 %686 }
 0xadf   :  { %v688_v45 = vsel %vm233_vm7, %v685_v40, %v687_v7  ;;  %v689_v8 = vsel %vm233_vm7, %v687_v7, %v685_v40 }
 0xae0   :  { %v690_v5 = vmul.f32 %v689_v8, %v1248_v59  ;;  %v691_v13 = vmul.f32 %v688_v45, %v1252_v60 }
 0xae2   :  { %v709_v35 = vpop.permute.xlu0 %708  ;;  %v695_v33 = vpop.permute.xlu1 %694 }
 0xae3   :  { %v696_v34 = vsel %vm250_vm8, %v693_v30, %v695_v33  ;;  %v697_v12 = vsel %vm250_vm8, %v695_v33, %v693_v30 }
 0xae4   :  { %v698_v21 = vmul.f32 %v697_v12, %v1256_v61  ;;  %v699_v14 = vmul.f32 %v696_v34, %v1259_v62 }
 0xae6   :  { %v748_v0 = vpack.c.bf16 %v698_v21, %v690_v5  ;;  %v703_v42 = vpop.permute.xlu1 %702  ;;  %v749_v17 = vpack.c.bf16 %v699_v14, %v691_v13  ;;  %v717_v1 = vpop.permute.xlu0 %716 }
 0xae7   :  { %v704_v18 = vsel %vm267_vm9, %v701_v10, %v703_v42  ;;  %v705_v29 = vsel %vm267_vm9, %v703_v42, %v701_v10 }
 0xae8   :  { %764 = vmatprep.subr.bf16.mxu0 %v749_v17  ;;  %v706_v61 = vmul.f32 %v705_v29, %v1277_v19  ;;  %v707_v62 = vmul.f32 %v704_v18, %v1281_v24 }
 0xae9   :  { %765 = vmatpush1.bf16.msra.mxu0 %v748_v0 }
 0xaea   :  { %v711_v32 = vpop.permute.xlu1 %710  ;;  %v725_v28 = vpop.permute.xlu0 %724 }
 0xaeb   :  { %v712_v59 = vsel %vm284_vm10, %v709_v35, %v711_v32  ;;  %v713_v60 = vsel %vm284_vm10, %v711_v32, %v709_v35 }
 0xaec   :  { %v714_v2 = vmul.f32 %v713_v60, %v1285_v25  ;;  %v715_v53 = vmul.f32 %v712_v59, %v1288_v26 }
 0xaee   :  { %v750_v4 = vpack.c.bf16 %v714_v2, %v706_v61  ;;  %v719_v27 = vpop.permute.xlu1 %718  ;;  %v751_v38 = vpack.c.bf16 %v715_v53, %v707_v62  ;;  %v733_v47 = vpop.permute.xlu0 %732 }
 0xaef   :  { %v720_v46 = vsel %vm301_vm11, %v717_v1, %v719_v27  ;;  %v721_v39 = vsel %vm301_vm11, %v719_v27, %v717_v1 }
 0xaf0   :  { %v722_v54 = vmul.f32 %v720_v46, %v1300_v36  ;;  %v723_v19 = vmul.f32 %v721_v39, %v1303_v37  ;;  %766 = vmatprep.subr.bf16.mxu0 %v751_v38 }
 0xaf1   :  { %767 = vmatpush1.bf16.msra.mxu0 %v750_v4 }
 0xaf2   :  { %v752_v24 = vpack.c.bf16 %v722_v54, %v1426_v9  ;;  %v727_v25 = vpop.permute.xlu1 %726  ;;  %v753_v26 = vpack.c.bf16 %v723_v19, %v683_v23  ;;  %v741_v23 = vpop.permute.xlu0 %740 }
 0xaf3   :  { %v728_v48 = vsel %vm318_vm12, %v725_v28, %v727_v25  ;;  %v729_v50 = vsel %vm318_vm12, %v727_v25, %v725_v28 }
 0xaf4   :  { %768 = vmatprep.subr.bf16.mxu0 %v753_v26  ;;  %v730_v3 = vmul.f32 %v728_v48, %v1324_v11  ;;  %v731_v31 = vmul.f32 %v729_v50, %v1327_v49 }
 0xaf5   :  { %769 = vmatpush1.bf16.msra.mxu0 %v752_v24 }
 0xaf6   :  { %v735_v52 = vpop.permute.xlu1 %734 }
 0xaf7   :  { %v736_v36 = vsel %vm335_vm13, %v733_v47, %v735_v52  ;;  %v737_v37 = vsel %vm335_vm13, %v735_v52, %v733_v47 }
 0xaf8   :  { %v738_v6 = vmul.f32 %v736_v36, %v1331_v15  ;;  %v739_v9 = vmul.f32 %v737_v37, %v1334_v41 }
 0xafa   :  { %v754_v30 = vpack.c.bf16 %v738_v6, %v730_v3  ;;  %v743_v40 = vpop.permute.xlu1 %742  ;;  %v755_v10 = vpack.c.bf16 %v739_v9, %v731_v31 }
 0xafb   :  { %v744_v7 = vsel %vm352_vm14, %v741_v23, %v743_v40  ;;  %v745_v45 = vsel %vm352_vm14, %v743_v40, %v741_v23 }
 0xafc   :  { %v746_v8 = vmul.f32 %v744_v7, %v1346_v20  ;;  %v747_v11 = vmul.f32 %v745_v45, %v1349_v56  ;;  %770 = vmatprep.subr.bf16.mxu0 %v755_v10 }
 0xafd   :  { %771 = vmatpush1.bf16.msra.mxu0 %v754_v30 }
 0xafe   :  { %v756_v49 = vpack.c.bf16 %v746_v8, %v746_v8  ;;  %v757_v15 = vpack.c.bf16 %v747_v11, %v747_v11 }
 0xb00   :  { %940 = vmatprep.subr.msk.bf16.mxu0 %vm379_vm15, %v757_v15  ;;  %v759_v41 = vsel %vm379_vm15, %v756_v49, 0 }
 0xb01   :  { %773 = vmatpush1.bf16.msra.mxu0 %v759_v41 }
 0xb04   :  { %941 = vmatmul.mubr.msk.bf16.vlgmr.msra.gmra.mrb[8].mxu0 %vm375_vm0, %v1366_v55 }
 0xbd7   :  { %v798_v35 = vpop.f32.mrb[8].mxu0 }
 0xbd8   :  { %v800_v33 = vpop.f32.mrb[9].mxu0 }
 0xbd9   :  { %v802_v51 = vpop.f32.mrb[10].mxu0  ;;  %v805_v34 = vadd.f32 %v800_v33, %v798_v35 }
 0xbda   :  { %v803_v12 = vpop.f32.mrb[11].mxu0 }
 0xbdb   :  { %806 = vadd.xlane.f32.xlu0 %v805_v34 }
 0xc68   :  { %v807_v20 = vpop.xlane.xlu0 %806 }
 0xc69   :  { %v808_v56 = vmul.f32 0.00390625, %v807_v20 }
 0xc6b   :  { %v809_v5 = vsub.f32 %v798_v35, %v808_v56  ;;  %v810_v13 = vsub.f32 %v800_v33, %v808_v56 }
 0xc6d   :  { %v811_v21 = vmul.f32 %v809_v5, %v809_v5  ;;  %v812_v14 = vmul.f32 %v810_v13, %v810_v13 }
 0xc6f   :  { %v813_v0 = vadd.f32 %v812_v14, %v811_v21 }
 0xc71   :  { %814 = vadd.xlane.f32.xlu1 %v813_v0 }
 0xcfe   :  { %v815_v42 = vpop.xlane.xlu1 %814 }
 0xcff   :  { %v816_v17 = vmul.f32 0.00390625, %v815_v42 }
 0xd01   :  { %v817_v1 = vadd.f32 1e-06, %v816_v17 }
 0xd03   :  { %1002 = vrsqrt.f32 %v817_v1 }
 0xd0d   :  { %v1003_v18 = vpop.eup %1002 }
 0xd0e   :  { %v819_v55 = vmul.f32 %v1003_v18, %v1394_v16 }
 0xd10   :  { %822 = vperm.xlu0 %957, %v819_v55  }
 0xd8f   :  { %v823_v29 = vpop.permute.xlu0 %822 }
 0xd90   :  { %v825_v32 = vmul.f32 %v823_v29, %v809_v5  ;;  %v826_v59 = vmul.f32 %v823_v29, %v810_v13 }
 0xd92   :  { %v827_v60 = vadd.f32 %v825_v32, %v1398_v22  ;;  %v828_v61 = vadd.f32 %v826_v59, %v1398_v22 }
 0xd94   :  { %v831_v62 = vmul.f32 1.442695, %v827_v60  ;;  %v833_v2 = vmul.f32 1.442695, %v828_v61  ;;  %vm829_vm7 = vcmp.gt.f32.partialorder %v827_v60, 0.0  ;;  %vm830_vm8 = vcmp.gt.f32.partialorder %v828_v61, 0.0 }
 0xd96   :  { %1004 = vpow2.f32 %v831_v62 }
 0xd97   :  { %1006 = vpow2.f32 %v833_v2 }
 0xda0   :  { %v1005_v53 = vpop.eup %1004 }
 0xda1   :  { %v1007_v28 = vpop.eup %1006  ;;  %v942_v4 = vadd.f32 -1.0, %v1005_v53 }
 0xda2   :  { %v943_v27 = vadd.f32 -1.0, %v1007_v28 }
 0xda3   :  { %v837_v38 = vsel %vm829_vm7, %v827_v60, %v942_v4 }
 0xda4   :  { %v838_v16 = vsel %vm830_vm8, %v828_v61, %v943_v27  ;;  %v839_v46 = vpack.c.bf16 %v837_v38, %v837_v38 }
 0xda5   :  { %v840_v39 = vpack.c.bf16 %v838_v16, %v838_v16 }
 0xda6   :  { %v842_v54 = vsel %vm379_vm15, %v839_v46, 0 }
 0xda7   :  { %944 = vmatprep.subr.msk.bf16.mxu1 %vm379_vm15, %v840_v39 }
 0xda8   :  { %848 = vmatpush1.bf16.msra.mxu1 %v842_v54 }
 0xdab   :  { %945 = vmatmul.mubr.msk.bf16.vlgmr.msra.gmra.mrb[8].mxu1 %vm473_vm2, %v1411_v63 }
 0xe7e   :  { %v881_v22 = vpop.f32.mrb[8].mxu1 }
 0xe7f   :  { %v890_v19 = vadd.f32 %v1221_v43, %v881_v22  ;;  %v883_v24 = vpop.f32.mrb[9].mxu1 }
 0xe80   :  { %v891_v25 = vadd.f32 %v1226_v44, %v883_v24  ;;  %v885_v26 = vpop.f32.mrb[10].mxu1 }
 0xe81   :  { %895 = vst [vmem:[#allocation2 + $0x20] sm:$0xff] %v890_v19  ;;  %v892_v47 = vadd.f32 %v1374_v57, %v885_v26  ;;  %v887_v48 = vpop.f32.mrb[11].mxu1 }
 0xe82   :  { %896 = vst [vmem:[#allocation2 + $0x28] sm:$0xff] %v891_v25  ;;  %v893_v50 = vadd.f32 %v1379_v58, %v887_v48 }
 0xe83   :  { %897 = vst [vmem:[#allocation2 + $0x30] sm:$0xff] %v892_v47 }
 0xe84   :  { %898 = vst [vmem:[#allocation2 + $0x38] sm:$0xff] %v893_v50 }
 0xe85   :  { %1019 = shalt.err (!%p1016_p4)
}
 0xe86   :  { %s1020_s19 = scalar_lea.hbm %s1540_s11, 1024 }
 0xe87   :  { %p1021_p5 = scmp.ne.s32.totalorder %s1540_s11, %s1020_s19  ;;  %p1024_p6 = scmp.lt.u32.totalorder %s1020_s19, %s1540_s11 }
 0xe89   :  { %p1026_p7 = pnand %p1024_p6, %p1021_p5 }
 0xe8b   :  { %1029 = shalt.err (!%p1026_p7)
}
 0xe8c   :  { %s1042_s24 = smov 256  }
 0xe8d   :  { %910 = dma.vmem_to_hbm [thread:$0]  %s905_s16, 1024, %s1540_s11, [#allocation3], %s1042_s24, %s1042_s24, %s1036_s18  }
 0xe8e   :  { %1030 = dma.done.wait [#allocation3], 1024  }
 0xe8f   :  { %1031 = vsyncadd [#allocation3], 4294966272 }
 0xe90   :  { %914 = vsyncpa [#allocation3], 1 }

</bundles_post_ra>
